<compile_context>
chip_gen: v5e
topology: v5e:2x2
jax: 0.10.0
libtpu: 0.0.40
codegen_flags: <defaults>
</compile_context>

<pallas_src>
import jax
import jax.numpy as jnp
from jax.experimental import pallas as pl
from jax.experimental.pallas import tpu as pltpu


# ----------------------------------------------------------------------------
# Kernel
# ----------------------------------------------------------------------------
def contra_kernel(alpha_ref,                       # scalar prefetch (SMEM, (1,))
                  feat_ref, adj_ref,               # inputs
                  w_enc_ref, b_enc_ref,
                  w1_ref, b1_ref, w2_ref, b2_ref,
                  h_ref, z_ref,                    # outputs (row tiles)
                  xw_ref):                         # VMEM scratch (N, H) bf16
    # ---- encoder projection, hoisted: computed once, reused by every tile ----
    @pl.when(pl.program_id(0) == 0)
    def _():
        xw = jnp.dot(feat_ref[...], w_enc_ref[...],
                     preferred_element_type=jnp.float32)
        xw_ref[...] = xw.astype(xw_ref.dtype)

    # ---- encoder: h_tile = relu(adj_tile @ xw + b_enc) ----
    h = jnp.dot(adj_ref[...], xw_ref[...], preferred_element_type=jnp.float32)
    h = jnp.maximum(h + b_enc_ref[...], 0.0)           # bias + ReLU in f32
    h_ref[...] = h.astype(h_ref.dtype)

    # ---- rep_projector: Linear -> PReLU -> Linear ----
    a1 = jnp.dot(h.astype(w1_ref.dtype), w1_ref[...],
                 preferred_element_type=jnp.float32)
    a1 = a1 + b1_ref[...]
    alpha = alpha_ref[0]                                # PReLU slope from SMEM
    a1 = jnp.where(a1 >= 0.0, a1, alpha * a1)
    z = jnp.dot(a1.astype(w2_ref.dtype), w2_ref[...],
                preferred_element_type=jnp.float32)
    z_ref[...] = (z + b2_ref[...]).astype(z_ref.dtype)


# ----------------------------------------------------------------------------
# Wrapper
# ----------------------------------------------------------------------------
def _estimate_vmem_bytes(tile_n, n, f_in, h, ph, p):
    bf, f4 = 2, 4
    b = 2 * tile_n * n * bf                       # adj row tile, double-buffered
    b += 2 * n * f_in * bf                        # feat (resident; conservative 2x)
    b += 2 * (f_in * h + h * ph + ph * p) * bf    # weights
    b += 2 * (h + ph + p) * f4                    # biases
    b += 2 * tile_n * (h + p) * f4                # h / z output tiles
    b += n * h * bf                               # hoisted xw scratch
    return b


def _pick_tile_n(n, f_in, h, ph, p, budget):
    for t in (1024, 512, 256, 128, 64, 32, 16, 8):
        if t <= n and n % t == 0 and _estimate_vmem_bytes(t, n, f_in, h, ph, p) <= budget:
            return t
    return n


def contra_forward(feat, adj, params, *, tile_n=None,
                   vmem_budget_bytes=40 * 1024 * 1024):
    n, f_in = feat.shape
    h_dim = params["w_enc"].shape[1]
    ph = params["w1"].shape[1]
    p = params["w2"].shape[1]

    # bf16 MXU operands, f32 accumulation inside the kernel.
    cdt = jnp.bfloat16
    feat_c = feat.astype(cdt)
    adj_c = adj.astype(cdt)
    w_enc = params["w_enc"].astype(cdt)
    w1 = params["w1"].astype(cdt)
    w2 = params["w2"].astype(cdt)
    b_enc = params["b_enc"].astype(jnp.float32).reshape(1, h_dim)
    b1 = params["b1"].astype(jnp.float32).reshape(1, ph)
    b2 = params["b2"].astype(jnp.float32).reshape(1, p)
    alpha = params["alpha"].astype(jnp.float32).reshape(-1)[:1]     # (1,) scalar

    if tile_n is None:
        tile_n = _pick_tile_n(n, f_in, h_dim, ph, p, vmem_budget_bytes)
    assert n % tile_n == 0, "N must be a multiple of the row tile"
    num_tiles = n // tile_n

    # index_maps receive (grid_i, alpha_prefetch_ref); the prefetch ref is unused.
    const = lambda shape: pl.BlockSpec(shape, lambda i, a: (0,) * len(shape))
    rows = lambda shape: pl.BlockSpec(shape, lambda i, a: (i, 0))

    grid_spec = pltpu.PrefetchScalarGridSpec(
        num_scalar_prefetch=1,
        grid=(num_tiles,),
        in_specs=[
            const((n, f_in)),        # feat (resident; consumed once at tile 0)
            rows((tile_n, n)),       # adj row tile
            const((f_in, h_dim)),    # w_enc
            const((1, h_dim)),       # b_enc
            const((h_dim, ph)),      # w1
            const((1, ph)),          # b1
            const((ph, p)),          # w2
            const((1, p)),           # b2
        ],
        out_specs=[
            rows((tile_n, h_dim)),   # h
            rows((tile_n, p)),       # z
        ],
        scratch_shapes=[pltpu.VMEM((n, h_dim), jnp.bfloat16)],   # hoisted xw
    )

    h_out, z_out = pl.pallas_call(
        contra_kernel,
        grid_spec=grid_spec,
        out_shape=[
            jax.ShapeDtypeStruct((n, h_dim), jnp.float32),
            jax.ShapeDtypeStruct((n, p), jnp.float32),
        ],
        compiler_params=pltpu.CompilerParams(
            # Must stay "arbitrary": the xw scratch is written at program_id==0
            # and reused by later iterations; a "parallel" axis (v7x megacore)
            # would give the second core an uninitialized scratch.
            dimension_semantics=("arbitrary",),
            vmem_limit_bytes=48 * 1024 * 1024,   # fits v7x's 64 MiB physical VMEM
        ),
    )(alpha, feat_c, adj_c, w_enc, b_enc, w1, b1, w2, b2)
    return h_out, z_out


# ----------------------------------------------------------------------------
# Params
# ----------------------------------------------------------------------------
def init_params(key, f_in, hidden, proj_hidden, proj, n_cluster=8):
    """Deterministic xavier-normal-style init (matches PyTorch module shapes)."""
    ks = jax.random.split(key, 4)

    def xavier(k, fan_in, fan_out):
        std = (2.0 / (fan_in + fan_out)) ** 0.5
        return std * jax.random.normal(k, (fan_in, fan_out), jnp.float32)

    return {
        "w_enc": xavier(ks[0], f_in, hidden),
        "b_enc": jnp.zeros((1, hidden), jnp.float32),
        "w1":    xavier(ks[1], hidden, proj_hidden),
        "b1":    jnp.zeros((1, proj_hidden), jnp.float32),
        "alpha": jnp.full((1,), 0.25, jnp.float32),     # nn.PReLU() default slope
        "w2":    xavier(ks[2], proj_hidden, proj),
        "b2":    jnp.zeros((1, proj), jnp.float32),
        # cluster_layer exists in Contra.__init__ but is unused in forward();
        # kept for parity with the module definition.
        "cluster_layer": xavier(ks[3], n_cluster, hidden),
    }


# ----------------------------------------------------------------------------
# Demo / sanity check
# ----------------------------------------------------------------------------
if __name__ == "__main__":
    # Small but lane-dense shapes: N=512 nodes, F_in=64 features,
    # hidden = proj_hidden = proj = 128 (multiples of 128 -> unmasked stores).
    N, F_in, H, PH, P = 512, 64, 128, 128, 128

    key = jax.random.PRNGKey(0)
    k_feat, k_adj, k_param = jax.random.split(key, 3)

    feat = jax.random.normal(k_feat, (N, F_in), jnp.float32)
    # symmetric row-normalized dense adjacency with self loops
    a = (jax.random.uniform(k_adj, (N, N)) > 0.5).astype(jnp.float32)
    a = jnp.maximum(a, a.T) + jnp.eye(N, dtype=jnp.float32)
    adj = a / jnp.sum(a, axis=1, keepdims=True)

    params = init_params(k_param, F_in, H, PH, P)

    # tile_n=128 forces a 4-step grid so the tiled/pipelined path (and the
    # hoisted-scratch reuse) is actually exercised at demo size; at production
    # sizes leave tile_n=None and let the VMEM-budget picker choose.
    h, z = contra_forward(feat, adj, params, tile_n=128)
    jax.block_until_ready((h, z))

    # Pure-JAX reference of the same forward with the same bf16-operand /
    # f32-accumulate arithmetic the kernel uses.
    bf = jnp.bfloat16
    xw = jnp.dot(feat.astype(bf), params["w_enc"].astype(bf),
                 preferred_element_type=jnp.float32).astype(bf)
    h_ref = jnp.maximum(
        jnp.dot(adj.astype(bf), xw, preferred_element_type=jnp.float32)
        + params["b_enc"], 0.0)
    a1 = jnp.dot(h_ref.astype(bf), params["w1"].astype(bf),
                 preferred_element_type=jnp.float32) + params["b1"]
    a1 = jnp.where(a1 >= 0.0, a1, params["alpha"][0] * a1)
    z_ref = jnp.dot(a1.astype(bf), params["w2"].astype(bf),
                    preferred_element_type=jnp.float32) + params["b2"]

    assert jnp.allclose(h, h_ref, atol=2e-2, rtol=2e-2), "h mismatch"
    assert jnp.allclose(z, z_ref, atol=2e-2, rtol=2e-2), "z mismatch"

    # TODO(synk): kl_cluster(z1, z2) (Student-t soft assignments against
    # cluster_layer) is not part of forward() and is left unimplemented.
    print("KERNEL_OK")
</pallas_src>

<mosaic_0001>
module attributes {stable_mosaic.version = 11 : i64} {
  func.func @contra_kernel(%arg0: i32, %arg1: memref<1xf32, #tpu.memory_space<smem>>, %arg2: memref<512x64xbf16, #tpu.memory_space<vmem>>, %arg3: memref<128x512xbf16, #tpu.memory_space<vmem>>, %arg4: memref<64x128xbf16, #tpu.memory_space<vmem>>, %arg5: memref<1x128xf32, #tpu.memory_space<vmem>>, %arg6: memref<128x128xbf16, #tpu.memory_space<vmem>>, %arg7: memref<1x128xf32, #tpu.memory_space<vmem>>, %arg8: memref<128x128xbf16, #tpu.memory_space<vmem>>, %arg9: memref<1x128xf32, #tpu.memory_space<vmem>>, %arg10: memref<128x128xf32, #tpu.memory_space<vmem>>, %arg11: memref<128x128xf32, #tpu.memory_space<vmem>>, %arg12: memref<512x128xbf16, #tpu.memory_space<vmem>>) attributes {dimension_semantics = [#tpu.dimension_semantics<arbitrary>], iteration_bounds = array<i64: 4>, scalar_prefetch = 1 : i64, scratch_operands = 1 : i64, tpu.core_type = #tpu.core_type<tc>, window_params = [{pipeline_mode = #tpu.pipeline_mode<synchronous>, transform_indices = @transform_0, window_bounds = array<i64: 512, 64>}, {transform_indices = @transform_1, window_bounds = array<i64: 128, 512>}, {pipeline_mode = #tpu.pipeline_mode<synchronous>, transform_indices = @transform_2, window_bounds = array<i64: 64, 128>}, {pipeline_mode = #tpu.pipeline_mode<synchronous>, transform_indices = @transform_3, window_bounds = array<i64: 1, 128>}, {pipeline_mode = #tpu.pipeline_mode<synchronous>, transform_indices = @transform_4, window_bounds = array<i64: 128, 128>}, {pipeline_mode = #tpu.pipeline_mode<synchronous>, transform_indices = @transform_5, window_bounds = array<i64: 1, 128>}, {pipeline_mode = #tpu.pipeline_mode<synchronous>, transform_indices = @transform_6, window_bounds = array<i64: 128, 128>}, {pipeline_mode = #tpu.pipeline_mode<synchronous>, transform_indices = @transform_7, window_bounds = array<i64: 1, 128>}, {transform_indices = @transform_8, window_bounds = array<i64: 128, 128>}, {transform_indices = @transform_9, window_bounds = array<i64: 128, 128>}]} {
    %c0_i32 = arith.constant 0 : i32
    %0 = arith.cmpi eq, %arg0, %c0_i32 : i32
    %1 = arith.extui %0 : i1 to i32
    %c0_i32_0 = arith.constant 0 : i32
    %2 = arith.cmpi ne, %1, %c0_i32_0 : i32
    scf.if %2 {
      %c0_23 = arith.constant 0 : index
      %c0_24 = arith.constant 0 : index
      %31 = vector.load %arg2[%c0_23, %c0_24] : memref<512x64xbf16, #tpu.memory_space<vmem>>, vector<512x64xbf16>
      %c0_25 = arith.constant 0 : index
      %c0_26 = arith.constant 0 : index
      %32 = vector.load %arg4[%c0_25, %c0_26] : memref<64x128xbf16, #tpu.memory_space<vmem>>, vector<64x128xbf16>
      %cst_27 = arith.constant dense<0.000000e+00> : vector<512x128xf32>
      %33 = tpu.matmul %31, %32, %cst_27 {dimension_numbers = #tpu.dot_dimension_numbers<[1], [0], [0], [1], [0, 0, 1, 1], [], []>} : vector<512x64xbf16>, vector<64x128xbf16>, vector<512x128xf32> -> vector<512x128xf32>
      %34 = arith.truncf %33 : vector<512x128xf32> to vector<512x128xbf16>
      %c0_28 = arith.constant 0 : index
      %c0_29 = arith.constant 0 : index
      %35 = vector.load %arg12[%c0_28, %c0_29] : memref<512x128xbf16, #tpu.memory_space<vmem>>, vector<512x128xbf16>
      tpu.vector_store %arg12[%c0_28, %c0_29], %34 {strides = array<i32>} : memref<512x128xbf16, #tpu.memory_space<vmem>>, vector<512x128xbf16>,
    } else {
    }
    %c0 = arith.constant 0 : index
    %c0_1 = arith.constant 0 : index
    %3 = vector.load %arg3[%c0, %c0_1] : memref<128x512xbf16, #tpu.memory_space<vmem>>, vector<128x512xbf16>
    %c0_2 = arith.constant 0 : index
    %c0_3 = arith.constant 0 : index
    %4 = vector.load %arg12[%c0_2, %c0_3] : memref<512x128xbf16, #tpu.memory_space<vmem>>, vector<512x128xbf16>
    %cst = arith.constant dense<0.000000e+00> : vector<128x128xf32>
    %5 = tpu.matmul %3, %4, %cst {dimension_numbers = #tpu.dot_dimension_numbers<[1], [0], [0], [1], [0, 0, 1, 1], [], []>} : vector<128x512xbf16>, vector<512x128xbf16>, vector<128x128xf32> -> vector<128x128xf32>
    %c0_4 = arith.constant 0 : index
    %c0_5 = arith.constant 0 : index
    %6 = vector.load %arg5[%c0_4, %c0_5] : memref<1x128xf32, #tpu.memory_space<vmem>>, vector<1x128xf32>
    %7 = vector.broadcast %6 : vector<1x128xf32> to vector<128x128xf32>
    %8 = arith.addf %5, %7 : vector<128x128xf32>
    %cst_6 = arith.constant 0.000000e+00 : f32
    %9 = vector.broadcast %cst_6 : f32 to vector<128x128xf32>
    %10 = arith.maximumf %8, %9 : vector<128x128xf32>
    %c0_7 = arith.constant 0 : index
    %c0_8 = arith.constant 0 : index
    %11 = vector.load %arg10[%c0_7, %c0_8] : memref<128x128xf32, #tpu.memory_space<vmem>>, vector<128x128xf32>
    tpu.vector_store %arg10[%c0_7, %c0_8], %10 {strides = array<i32>} : memref<128x128xf32, #tpu.memory_space<vmem>>, vector<128x128xf32>,
    %12 = arith.truncf %10 : vector<128x128xf32> to vector<128x128xbf16>
    %c0_9 = arith.constant 0 : index
    %c0_10 = arith.constant 0 : index
    %13 = vector.load %arg6[%c0_9, %c0_10] : memref<128x128xbf16, #tpu.memory_space<vmem>>, vector<128x128xbf16>
    %cst_11 = arith.constant dense<0.000000e+00> : vector<128x128xf32>
    %14 = tpu.matmul %12, %13, %cst_11 {dimension_numbers = #tpu.dot_dimension_numbers<[1], [0], [0], [1], [0, 0, 1, 1], [], []>} : vector<128x128xbf16>, vector<128x128xbf16>, vector<128x128xf32> -> vector<128x128xf32>
    %c0_12 = arith.constant 0 : index
    %c0_13 = arith.constant 0 : index
    %15 = vector.load %arg7[%c0_12, %c0_13] : memref<1x128xf32, #tpu.memory_space<vmem>>, vector<1x128xf32>
    %16 = vector.broadcast %15 : vector<1x128xf32> to vector<128x128xf32>
    %17 = arith.addf %14, %16 : vector<128x128xf32>
    %c0_14 = arith.constant 0 : index
    %18 = memref.load %arg1[%c0_14] : memref<1xf32, #tpu.memory_space<smem>>
    %cst_15 = arith.constant 0.000000e+00 : f32
    %19 = vector.broadcast %cst_15 : f32 to vector<128x128xf32>
    %20 = arith.cmpf oge, %17, %19 : vector<128x128xf32>
    %21 = vector.broadcast %18 : f32 to vector<128x128xf32>
    %22 = arith.mulf %21, %17 : vector<128x128xf32>
    %23 = arith.select %20, %17, %22 : vector<128x128xi1>, vector<128x128xf32>
    %24 = arith.truncf %23 : vector<128x128xf32> to vector<128x128xbf16>
    %c0_16 = arith.constant 0 : index
    %c0_17 = arith.constant 0 : index
    %25 = vector.load %arg8[%c0_16, %c0_17] : memref<128x128xbf16, #tpu.memory_space<vmem>>, vector<128x128xbf16>
    %cst_18 = arith.constant dense<0.000000e+00> : vector<128x128xf32>
    %26 = tpu.matmul %24, %25, %cst_18 {dimension_numbers = #tpu.dot_dimension_numbers<[1], [0], [0], [1], [0, 0, 1, 1], [], []>} : vector<128x128xbf16>, vector<128x128xbf16>, vector<128x128xf32> -> vector<128x128xf32>
    %c0_19 = arith.constant 0 : index
    %c0_20 = arith.constant 0 : index
    %27 = vector.load %arg9[%c0_19, %c0_20] : memref<1x128xf32, #tpu.memory_space<vmem>>, vector<1x128xf32>
    %28 = vector.broadcast %27 : vector<1x128xf32> to vector<128x128xf32>
    %29 = arith.addf %26, %28 : vector<128x128xf32>
    %c0_21 = arith.constant 0 : index
    %c0_22 = arith.constant 0 : index
    %30 = vector.load %arg11[%c0_21, %c0_22] : memref<128x128xf32, #tpu.memory_space<vmem>>, vector<128x128xf32>
    tpu.vector_store %arg11[%c0_21, %c0_22], %29 {strides = array<i32>} : memref<128x128xf32, #tpu.memory_space<vmem>>, vector<128x128xf32>,
    return
  }
  func.func @transform_0(%arg0: i32, %arg1: memref<1xf32, #tpu.memory_space<smem>>) -> (i32, i32) {
    %c0_i32 = arith.constant 0 : i32
    %c0_i32_0 = arith.constant 0 : i32
    %c0_i32_1 = arith.constant 0 : i32
    return %c0_i32, %c0_i32_0 : i32, i32
  }
  func.func @transform_1(%arg0: i32, %arg1: memref<1xf32, #tpu.memory_space<smem>>) -> (i32, i32) {
    %c0_i32 = arith.constant 0 : i32
    %c0_i32_0 = arith.constant 0 : i32
    return %arg0, %c0_i32 : i32, i32
  }
  func.func @transform_2(%arg0: i32, %arg1: memref<1xf32, #tpu.memory_space<smem>>) -> (i32, i32) {
    %c0_i32 = arith.constant 0 : i32
    %c0_i32_0 = arith.constant 0 : i32
    %c0_i32_1 = arith.constant 0 : i32
    return %c0_i32, %c0_i32_0 : i32, i32
  }
  func.func @transform_3(%arg0: i32, %arg1: memref<1xf32, #tpu.memory_space<smem>>) -> (i32, i32) {
    %c0_i32 = arith.constant 0 : i32
    %c0_i32_0 = arith.constant 0 : i32
    %c0_i32_1 = arith.constant 0 : i32
    return %c0_i32, %c0_i32_0 : i32, i32
  }
  func.func @transform_4(%arg0: i32, %arg1: memref<1xf32, #tpu.memory_space<smem>>) -> (i32, i32) {
    %c0_i32 = arith.constant 0 : i32
    %c0_i32_0 = arith.constant 0 : i32
    %c0_i32_1 = arith.constant 0 : i32
    return %c0_i32, %c0_i32_0 : i32, i32
  }
  func.func @transform_5(%arg0: i32, %arg1: memref<1xf32, #tpu.memory_space<smem>>) -> (i32, i32) {
    %c0_i32 = arith.constant 0 : i32
    %c0_i32_0 = arith.constant 0 : i32
    %c0_i32_1 = arith.constant 0 : i32
    return %c0_i32, %c0_i32_0 : i32, i32
  }
  func.func @transform_6(%arg0: i32, %arg1: memref<1xf32, #tpu.memory_space<smem>>) -> (i32, i32) {
    %c0_i32 = arith.constant 0 : i32
    %c0_i32_0 = arith.constant 0 : i32
    %c0_i32_1 = arith.constant 0 : i32
    return %c0_i32, %c0_i32_0 : i32, i32
  }
  func.func @transform_7(%arg0: i32, %arg1: memref<1xf32, #tpu.memory_space<smem>>) -> (i32, i32) {
    %c0_i32 = arith.constant 0 : i32
    %c0_i32_0 = arith.constant 0 : i32
    %c0_i32_1 = arith.constant 0 : i32
    return %c0_i32, %c0_i32_0 : i32, i32
  }
  func.func @transform_8(%arg0: i32, %arg1: memref<1xf32, #tpu.memory_space<smem>>) -> (i32, i32) {
    %c0_i32 = arith.constant 0 : i32
    %c0_i32_0 = arith.constant 0 : i32
    return %arg0, %c0_i32 : i32, i32
  }
  func.func @transform_9(%arg0: i32, %arg1: memref<1xf32, #tpu.memory_space<smem>>) -> (i32, i32) {
    %c0_i32 = arith.constant 0 : i32
    %c0_i32_0 = arith.constant 0 : i32
    return %arg0, %c0_i32 : i32, i32
  }
}

</mosaic_0001>

<bundles_post_ra>
// kernel: tpu_custom_call.1
= control target key start
LH: loop header
LB: loop body
LE: loop exit
PB: predicated region body
PF: predicated region fallthrough
CT: control target
= control target key end

     0   :  { %s3818_s0 = inlined_call_operand.<no memory space> [shape: f32[1], index: 0, kind: input, shape index: {}]   ;;  %s3819_s1 = inlined_call_operand.vmem [shape: bf16[512,64], index: 1, kind: input, shape index: {}]   ;;  %s3820_s2 = inlined_call_operand.hbm [shape: bf16[512,512], index: 2, kind: input, shape index: {}]   ;;  %s3821_s3 = inlined_call_operand.vmem [shape: bf16[64,128], index: 3, kind: input, shape index: {}]   ;;  %s3822_s4 = inlined_call_operand.vmem [shape: f32[1,128], index: 4, kind: input, shape index: {}]   ;;  %s3823_s5 = inlined_call_operand.vmem [shape: bf16[128,128], index: 5, kind: input, shape index: {}]   ;;  %s3824_s6 = inlined_call_operand.vmem [shape: f32[1,128], index: 6, kind: input, shape index: {}]   ;;  %s3825_s7 = inlined_call_operand.vmem [shape: bf16[128,128], index: 7, kind: input, shape index: {}]   ;;  %s3826_s8 = inlined_call_operand.vmem [shape: f32[1,128], index: 8, kind: input, shape index: {}]   ;;  %s3827_s9 = inlined_call_operand.hbm [shape: f32[512,128], index: 9, kind: output, shape index: {0}]   ;;  %s3828_s10 = inlined_call_operand.hbm [shape: f32[512,128], index: 10, kind: output, shape index: {1}]  }
   0x1   :  { %16 = sst [smem:[#allocation4]] %s3818_s0 }
   0x2   :  { %17 = vsyncpa [#allocation6], 0 }
   0x3   :  { %19 = vsyncpa [#allocation6 + $0x1], 0 }
   0x4   :  { %20 = vsyncpa [#allocation7], 0 }
   0x5   :  { %22 = vsyncpa [#allocation7 + $0x1], 0 }
   0x6   :  { %23 = vsyncpa [#allocation10], 0 }
   0x7   :  { %25 = vsyncpa [#allocation10 + $0x1], 0  ;;  %s3270_s15 = smov 0   ;;  %s3272_s16 = smov 0  }
   0x8   :  { %s3274_s17 = smov 0   ;;  %s3276_s18 = smov 0  }
   0x9 LB: > { %3832 = sst [smem:[#allocation14_spill]] %s3202_s17  ;;  %s3291_s0 = sadd.s32 4294967295, %s3206_s18   ;;  %s3206_s18 = sphi %s3276_s18, %s3840_s18   ;;  %s3202_s17 = sphi %s3274_s17, %s3842_s17   ;;  %s3198_s16 = sphi %s3272_s16, %s3844_s16   ;;  %s3194_s15 = sphi %s3270_s15, %s3843_s15  }
   0xa   : > { %s2165_s19 = sadd.s32 4294967294, %s3206_s18   ;;  %s3295_s20 = sadd.s32 1, %s3206_s18  }
   0xb   : > { %3833 = sst [smem:[#allocation15_spill]] %s3295_s20  ;;  %s59_s21 = sadd.s32 1, %s3202_s17 }
   0xc   : > { %s56_s22 = ssub.s32 %s3206_s18, %s3295_s20  ;;  %p66_p0 = scmp.ne.s32.totalorder %s3202_s17, %s3198_s16 }
   0xd   : > { %p57_p1 = scmp.eq.s32.totalorder %s56_s22, 0  ;;  %p67_p2 = scmp.eq.s32.totalorder %s3206_s18, 0 }
   0xe   : > { %p72_p3 = scmp.ne.s32.totalorder %s3198_s16, %s3194_s15  ;;  %p73_p4 = scmp.eq.s32.totalorder %s3291_s0, 0 }
   0xf   : > { %s3307_s23 = scalar_select %p57_p1, %s3202_s17, %s59_s21  }
  0x10   : > { %p3309_p5 = por %p67_p2, %p66_p0  ;;  %p3313_p6 = por %p73_p4, %p72_p3 }
  0x11   : > { %3834 = sst [smem:[#allocation16_spill]] %s3307_s23  ;;  %p222_p7 = scmp.eq.s32.totalorder %s3291_s0, 3 }
  0x12   : > { %p228_p8 = scmp.eq.s32.totalorder %s2165_s19, 3  ;;  %p3037_p9 = scmp.lt.s32.totalorder %s3206_s18, 4 }
  0x13   : > { %p3319_p10 = por %p222_p7, %p66_p0  ;;  %s295_s28 = sand.u32 1, %s3202_s17  }
  0x14   : > { %p3323_p11 = por %p228_p8, %p72_p3  ;;  %s2682_s29 = sshll.u32 %s3206_s18, 8 }
  0x15   : > { %s2168_s30 = sshll.u32 %s295_s28, 8  ;;  %s305_s13 = scalar_lea.hbm %s3820_s2, %s2682_s29 }
  0x16   : > { %s306_s14 = sshll.u32 %s305_s13, 4  ;;  %s299_s21 = scalar_lea.vmem [#allocation5], %s2168_s30  ;;  %s307_s14 = int_to_ptr.hbm [resolvable:$true] %s306_s14 }
  0x17   : > { %s308_s22 = sshll.u32 %s299_s21, 4  ;;  %p3334_p12 = pnand %p3037_p9, %p3309_p5  ;;  %s309_s22 = int_to_ptr.vmem [resolvable:$true] %s308_s22 }
  0x18   : > { %p2172_p13 = scmp.ge.s32.totalorder %s3206_s18, 1  ;;  %p316_p0 = scmp.lt.s32.totalorder %s3206_s18, 5 }
  0x19   : > { %s296_s23 = scalar_lea.sflag [#allocation6], %s295_s28  ;;  %s3078_s17 = sshra.s32 %s307_s14, 4  ;;  %s3079_s17 = int_to_ptr.hbm [resolvable:$true] %s3078_s17 }
  0x1a   : > { %s3080_s20 = scalar_lea.hbm %s3079_s17, 256  ;;  %p3082_p2 = pneg %p3334_p12 }
  0x1b   : > { %p3081_p1 = scmp.ne.s32.totalorder %s3079_s17, %s3080_s20  ;;  %s3085_s24 = scalar_lea.hbm %s3820_s2, 1024 }
  0x1c   : > { %p3086_p5 = scmp.lt.s32.totalorder %s3079_s17, %s3820_s2  ;;  %p3087_p7 = scmp.lt.s32.totalorder %s3085_s24, %s3080_s20 }
  0x1d   : > { %p3083_p3 = pnand %p3082_p2, %p3081_p1 }
  0x1e   : > { %p3088_p8 = por %p3087_p7, %p3086_p5 }
  0x1f   : > { %p3084_p4 = pneg %p3083_p3 }
  0x21   : > { %p3089_p9 = pnand %p3088_p8, %p3084_p4 }
  0x23   : > { %3092 = shalt.err (!%p3089_p9)
}
  0x24   : > { %s3208_s28 = smov 256   ;;  %s3209_s13 = smov 16  }
  0x25   : > { %3029 = dma.hbm_to_vmem [thread:$0]  (!%p3334_p12), %s307_s14, 4096, %s309_s22, %s296_s23, %s3208_s28, %s3208_s28, %s3209_s13  }
  0x26   : > { %p317_p1 = pnand %p2172_p13, %p316_p0 }
  0x27   : > { %s3355_s21 = sand.u32 (!%p317_p1), 1, %s3198_s16  }
  0x28   : > { %320 = sbr.rel (%p317_p1) target bundleno = 962 (0x3c2), region = 52  ;;  %s2173_s17 = sshll.u32 (!%p317_p1), %s3355_s21, 8 }
  0x29   : > { %s323_s20 = scalar_lea.sflag (!%p317_p1), [#allocation6], %s3355_s21  ;;  %s3359_s29 = scalar_lea.vmem (!%p317_p1), [#allocation5], %s2173_s17 }
  0x2d   : > { %3181 = dma.done.wait (%p3313_p6), %s323_s20, 4096  }
  0x2e   : > { %3183 = vsyncadd (%p3313_p6), %s323_s20, 4294963200  ;;  %s2174_s23 = sshll.u32 %s3355_s21, 7  ;;  %p2176_p12 = scmp.ne.s32.totalorder %s3291_s0, 0 }
  0x2f   : > { %s3366_s14 = scalar_lea.vmem [#allocation8], %s2174_s23  ;;  %s3368_s22 = scalar_lea.vmem [#allocation9], %s2174_s23 }
  0x30   : > { %374 = sbr.rel (%p2176_p12) target bundleno = 326 (0x146), region = 60 }
  0x35   : > { %v2718_v0 = vld [vmem:[%s3821_s3 + $0x18] sm:$0xff]  ;;  %v2717_v1 = vld [vmem:[%s3821_s3 + $0x10] sm:$0xff]  ;;  %v2716_v2 = vld [vmem:[%s3821_s3 + $0x8] sm:$0xff]  ;;  %vm631_vm0 = vcmask 523264  }
  0x36   : > { %732 = vmatpush.bf16.msra.mxu0 %v2718_v0  ;;  %2992 = vmatpush.bf16.msra.mxu1 %v2718_v0  ;;  %v2715_v3 = vld [vmem:[%s3821_s3] sm:$0xff]  ;;  %v2684_v8 = vld [vmem:[%s3819_s1 + $0x8] sm:$0xff]  ;;  %v2685_v12 = vld [vmem:[%s3819_s1 + $0x10] sm:$0xff] }
  0x37   : > { %2993 = vmatpush.bf16.msra.mxu2 %v2718_v0  ;;  %2994 = vmatpush.bf16.msra.mxu3 %v2718_v0  ;;  %v2683_v4 = vld [vmem:[%s3819_s1] sm:$0xff]  ;;  %v2692_v9 = vld [vmem:[%s3819_s1 + $0x48] sm:$0xff]  ;;  %v2693_v13 = vld [vmem:[%s3819_s1 + $0x50] sm:$0xff] }
  0x38   : > { %v2691_v5 = vld [vmem:[%s3819_s1 + $0x40] sm:$0xff]  ;;  %v2700_v10 = vld [vmem:[%s3819_s1 + $0x88] sm:$0xff]  ;;  %v2701_v14 = vld [vmem:[%s3819_s1 + $0x90] sm:$0xff] }
  0x39   : > { %v2699_v6 = vld [vmem:[%s3819_s1 + $0x80] sm:$0xff]  ;;  %v2708_v11 = vld [vmem:[%s3819_s1 + $0xc8] sm:$0xff]  ;;  %v2709_v15 = vld [vmem:[%s3819_s1 + $0xd0] sm:$0xff] }
  0x3a   : > { %733 = vmatpush.bf16.msra.mxu0 %v2717_v1  ;;  %2995 = vmatpush.bf16.msra.mxu1 %v2717_v1  ;;  %v2707_v7 = vld [vmem:[%s3819_s1 + $0xc0] sm:$0xff]  ;;  %v2686_v16 = vld [vmem:[%s3819_s1 + $0x18] sm:$0xff]  ;;  %v2688_v24 = vld [vmem:[%s3819_s1 + $0x28] sm:$0xff] }
  0x3b   : > { %2996 = vmatpush.bf16.msra.mxu2 %v2717_v1  ;;  %2997 = vmatpush.bf16.msra.mxu3 %v2717_v1  ;;  %v2694_v17 = vld [vmem:[%s3819_s1 + $0x58] sm:$0xff]  ;;  %v2687_v20 = vld [vmem:[%s3819_s1 + $0x20] sm:$0xff]  ;;  %v2696_v25 = vld [vmem:[%s3819_s1 + $0x68] sm:$0xff] }
  0x3c   : > { %v2702_v18 = vld [vmem:[%s3819_s1 + $0x98] sm:$0xff]  ;;  %v2695_v21 = vld [vmem:[%s3819_s1 + $0x60] sm:$0xff]  ;;  %v2704_v26 = vld [vmem:[%s3819_s1 + $0xa8] sm:$0xff] }
  0x3d   : > { %v2710_v19 = vld [vmem:[%s3819_s1 + $0xd8] sm:$0xff]  ;;  %v2703_v22 = vld [vmem:[%s3819_s1 + $0xa0] sm:$0xff]  ;;  %v2712_v27 = vld [vmem:[%s3819_s1 + $0xe8] sm:$0xff] }
  0x3e   : > { %734 = vmatpush.bf16.msra.mxu0 %v2716_v2  ;;  %2998 = vmatpush.bf16.msra.mxu1 %v2716_v2  ;;  %v2711_v23 = vld [vmem:[%s3819_s1 + $0xe0] sm:$0xff]  ;;  %v2689_v28 = vld [vmem:[%s3819_s1 + $0x30] sm:$0xff]  ;;  %v2690_v32 = vld [vmem:[%s3819_s1 + $0x38] sm:$0xff] }
  0x3f   : > { %2999 = vmatpush.bf16.msra.mxu2 %v2716_v2  ;;  %3000 = vmatpush.bf16.msra.mxu3 %v2716_v2  ;;  %v2697_v29 = vld [vmem:[%s3819_s1 + $0x70] sm:$0xff]  ;;  %v2698_v33 = vld [vmem:[%s3819_s1 + $0x78] sm:$0xff] }
  0x40   : > { %v2705_v30 = vld [vmem:[%s3819_s1 + $0xb0] sm:$0xff]  ;;  %v2706_v34 = vld [vmem:[%s3819_s1 + $0xb8] sm:$0xff] }
  0x41   : > { %v2713_v31 = vld [vmem:[%s3819_s1 + $0xf0] sm:$0xff]  ;;  %v2714_v35 = vld [vmem:[%s3819_s1 + $0xf8] sm:$0xff] }
  0x42   : > { %735 = vmatpush.bf16.msra.mxu0 %v2715_v3  ;;  %3001 = vmatpush.bf16.msra.mxu1 %v2715_v3 }
  0x43   : > { %3002 = vmatpush.bf16.msra.mxu2 %v2715_v3  ;;  %3003 = vmatpush.bf16.msra.mxu3 %v2715_v3 }
  0x45   : > { %2321 = vmatmul.msk.bf16.vlgmr.msra.gmra.mxu0 %vm631_vm0, %v2683_v4  ;;  %2329 = vmatmul.msk.bf16.vlgmr.msra.gmra.mxu1 %vm631_vm0, %v2691_v5 }
  0x46   : > { %2337 = vmatmul.msk.bf16.vlgmr.msra.gmra.mxu2 %vm631_vm0, %v2699_v6  ;;  %2345 = vmatmul.msk.bf16.vlgmr.msra.gmra.mxu3 %vm631_vm0, %v2707_v7 }
  0x55   : > { %2322 = vmatmul.msk.bf16.gmra.mxu0 %vm631_vm0, %v2684_v8  ;;  %2330 = vmatmul.msk.bf16.gmra.mxu1 %vm631_vm0, %v2692_v9 }
  0x56   : > { %2338 = vmatmul.msk.bf16.gmra.mxu2 %vm631_vm0, %v2700_v10  ;;  %2346 = vmatmul.msk.bf16.gmra.mxu3 %vm631_vm0, %v2708_v11 }
  0x65   : > { %2323 = vmatmul.msk.bf16.gmra.mxu0 %vm631_vm0, %v2685_v12  ;;  %2331 = vmatmul.msk.bf16.gmra.mxu1 %vm631_vm0, %v2693_v13 }
  0x66   : > { %2339 = vmatmul.msk.bf16.gmra.mxu2 %vm631_vm0, %v2701_v14  ;;  %2347 = vmatmul.msk.bf16.gmra.mxu3 %vm631_vm0, %v2709_v15 }
  0x75   : > { %2324 = vmatmul.msk.bf16.gmra.mxu0 %vm631_vm0, %v2686_v16  ;;  %2332 = vmatmul.msk.bf16.gmra.mxu1 %vm631_vm0, %v2694_v17 }
  0x76   : > { %2340 = vmatmul.msk.bf16.gmra.mxu2 %vm631_vm0, %v2702_v18  ;;  %2348 = vmatmul.msk.bf16.gmra.mxu3 %vm631_vm0, %v2710_v19 }
  0x85   : > { %2325 = vmatmul.msk.bf16.gmra.mxu0 %vm631_vm0, %v2687_v20  ;;  %2333 = vmatmul.msk.bf16.gmra.mxu1 %vm631_vm0, %v2695_v21 }
  0x86   : > { %2341 = vmatmul.msk.bf16.gmra.mxu2 %vm631_vm0, %v2703_v22  ;;  %2349 = vmatmul.msk.bf16.gmra.mxu3 %vm631_vm0, %v2711_v23 }
  0x95   : > { %2326 = vmatmul.msk.bf16.gmra.mxu0 %vm631_vm0, %v2688_v24  ;;  %2334 = vmatmul.msk.bf16.gmra.mxu1 %vm631_vm0, %v2696_v25 }
  0x96   : > { %2342 = vmatmul.msk.bf16.gmra.mxu2 %vm631_vm0, %v2704_v26  ;;  %2350 = vmatmul.msk.bf16.gmra.mxu3 %vm631_vm0, %v2712_v27 }
  0xa5   : > { %2327 = vmatmul.msk.bf16.gmra.mxu0 %vm631_vm0, %v2689_v28  ;;  %2335 = vmatmul.msk.bf16.gmra.mxu1 %vm631_vm0, %v2697_v29 }
  0xa6   : > { %2343 = vmatmul.msk.bf16.gmra.mxu2 %vm631_vm0, %v2705_v30  ;;  %2351 = vmatmul.msk.bf16.gmra.mxu3 %vm631_vm0, %v2713_v31 }
  0xb5   : > { %2328 = vmatmul.msk.bf16.gmra.mxu0 %vm631_vm0, %v2690_v32  ;;  %2336 = vmatmul.msk.bf16.gmra.mxu1 %vm631_vm0, %v2698_v33 }
  0xb6   : > { %2344 = vmatmul.msk.bf16.gmra.mxu2 %vm631_vm0, %v2706_v34  ;;  %2352 = vmatmul.msk.bf16.gmra.mxu3 %vm631_vm0, %v2714_v35 }
  0xc2   : > { %v737_v36 = vpop.f32.mrf.mxu0  ;;  %v777_v37 = vpop.f32.mrf.mxu1 }
  0xc9   : > { %v817_v38 = vpop.f32.mrf.mxu2  ;;  %v857_v39 = vpop.f32.mrf.mxu3 }
  0xca   : > { %v739_v40 = vpop.f32.mrf.mxu0  ;;  %v779_v41 = vpop.f32.mrf.mxu1 }
  0xcb   : > { %v2804_v42 = vpack.c.bf16 %v739_v40, %v737_v36  ;;  %v2844_v43 = vpack.c.bf16 %v779_v41, %v777_v37 }
  0xcd   : > { %2805 = vst [vmem:[#allocation2 + $0xb0] sm:$0xff] %v2804_v42  }
  0xce   : > { %2968 = vst [vmem:[#allocation2 + $0x80] sm:$0xff] %v2844_v43  }
  0xd1   : > { %v819_v44 = vpop.f32.mrf.mxu2  ;;  %v859_v45 = vpop.f32.mrf.mxu3 }
  0xd2   : > { %v2884_v46 = vpack.c.bf16 %v819_v44, %v817_v38  ;;  %v2924_v47 = vpack.c.bf16 %v859_v45, %v857_v39  ;;  %v742_v48 = vpop.f32.mrf.mxu0  ;;  %v782_v49 = vpop.f32.mrf.mxu1 }
  0xd4   : > { %2976 = vst [vmem:[#allocation2 + $0x38] sm:$0xff] %v2884_v46  }
  0xd5   : > { %2984 = vst [vmem:[#allocation2 + $0xa8] sm:$0xff] %v2924_v47  }
  0xd9   : > { %v822_v50 = vpop.f32.mrf.mxu2  ;;  %v862_v51 = vpop.f32.mrf.mxu3 }
  0xda   : > { %v744_v52 = vpop.f32.mrf.mxu0  ;;  %v784_v53 = vpop.f32.mrf.mxu1 }
  0xdb   : > { %v2809_v54 = vpack.c.bf16 %v744_v52, %v742_v48  ;;  %v2849_v55 = vpack.c.bf16 %v784_v53, %v782_v49 }
  0xdd   : > { %2961 = vst [vmem:[#allocation2] sm:$0xff] %v2809_v54  }
  0xde   : > { %2969 = vst [vmem:[#allocation2 + $0x88] sm:$0xff] %v2849_v55  }
  0xe1   : > { %v824_v56 = vpop.f32.mrf.mxu2  ;;  %v864_v57 = vpop.f32.mrf.mxu3 }
  0xe2   : > { %v2889_v58 = vpack.c.bf16 %v824_v56, %v822_v50  ;;  %v2929_v59 = vpack.c.bf16 %v864_v57, %v862_v51  ;;  %v747_v60 = vpop.f32.mrf.mxu0  ;;  %v787_v61 = vpop.f32.mrf.mxu1 }
  0xe4   : > { %2977 = vst [vmem:[#allocation2 + $0x58] sm:$0xff] %v2889_v58  }
  0xe5   : > { %2985 = vst [vmem:[#allocation2 + $0xd0] sm:$0xff] %v2929_v59  }
  0xe9   : > { %v827_v62 = vpop.f32.mrf.mxu2  ;;  %v867_v63 = vpop.f32.mrf.mxu3 }
  0xea   : > { %v749_v0 = vpop.f32.mrf.mxu0  ;;  %v789_v1 = vpop.f32.mrf.mxu1 }
  0xeb   : > { %v2814_v2 = vpack.c.bf16 %v749_v0, %v747_v60  ;;  %v2854_v3 = vpack.c.bf16 %v789_v1, %v787_v61 }
  0xed   : > { %2962 = vst [vmem:[#allocation2 + $0xd8] sm:$0xff] %v2814_v2  }
  0xee   : > { %2970 = vst [vmem:[#allocation2 + $0xe8] sm:$0xff] %v2854_v3  }
  0xf1   : > { %v829_v4 = vpop.f32.mrf.mxu2  ;;  %v869_v5 = vpop.f32.mrf.mxu3 }
  0xf2   : > { %v2894_v6 = vpack.c.bf16 %v829_v4, %v827_v62  ;;  %v2934_v7 = vpack.c.bf16 %v869_v5, %v867_v63  ;;  %v752_v8 = vpop.f32.mrf.mxu0  ;;  %v792_v9 = vpop.f32.mrf.mxu1 }
  0xf4   : > { %2978 = vst [vmem:[#allocation2 + $0x40] sm:$0xff] %v2894_v6  }
  0xf5   : > { %2986 = vst [vmem:[#allocation2 + $0x10] sm:$0xff] %v2934_v7  }
  0xf9   : > { %v832_v10 = vpop.f32.mrf.mxu2  ;;  %v872_v11 = vpop.f32.mrf.mxu3 }
  0xfa   : > { %v754_v12 = vpop.f32.mrf.mxu0  ;;  %v794_v13 = vpop.f32.mrf.mxu1 }
  0xfb   : > { %v2819_v14 = vpack.c.bf16 %v754_v12, %v752_v8  ;;  %v2859_v15 = vpack.c.bf16 %v794_v13, %v792_v9 }
  0xfd   : > { %2963 = vst [vmem:[#allocation2 + $0x18] sm:$0xff] %v2819_v14  }
  0xfe   : > { %2971 = vst [vmem:[#allocation2 + $0xb8] sm:$0xff] %v2859_v15  }
 0x101   : > { %v834_v16 = vpop.f32.mrf.mxu2  ;;  %v874_v17 = vpop.f32.mrf.mxu3 }
 0x102   : > { %v2899_v18 = vpack.c.bf16 %v834_v16, %v832_v10  ;;  %v2939_v19 = vpack.c.bf16 %v874_v17, %v872_v11  ;;  %v757_v20 = vpop.f32.mrf.mxu0  ;;  %v797_v21 = vpop.f32.mrf.mxu1 }
 0x104   : > { %2979 = vst [vmem:[#allocation2 + $0xc8] sm:$0xff] %v2899_v18  }
 0x105   : > { %2987 = vst [vmem:[#allocation2 + $0x28] sm:$0xff] %v2939_v19  }
 0x109   : > { %v837_v22 = vpop.f32.mrf.mxu2  ;;  %v877_v23 = vpop.f32.mrf.mxu3 }
 0x10a   : > { %v759_v24 = vpop.f32.mrf.mxu0  ;;  %v799_v25 = vpop.f32.mrf.mxu1 }
 0x10b   : > { %v2824_v26 = vpack.c.bf16 %v759_v24, %v757_v20  ;;  %v2864_v27 = vpack.c.bf16 %v799_v25, %v797_v21 }
 0x10d   : > { %2964 = vst [vmem:[#allocation2 + $0x50] sm:$0xff] %v2824_v26  }
 0x10e   : > { %2972 = vst [vmem:[#allocation2 + $0x60] sm:$0xff] %v2864_v27  }
 0x111   : > { %v839_v28 = vpop.f32.mrf.mxu2  ;;  %v879_v29 = vpop.f32.mrf.mxu3 }
 0x112   : > { %v2904_v30 = vpack.c.bf16 %v839_v28, %v837_v22  ;;  %v2944_v31 = vpack.c.bf16 %v879_v29, %v877_v23  ;;  %v762_v32 = vpop.f32.mrf.mxu0  ;;  %v802_v33 = vpop.f32.mrf.mxu1 }
 0x114   : > { %2980 = vst [vmem:[#allocation2 + $0xe0] sm:$0xff] %v2904_v30  }
 0x115   : > { %2988 = vst [vmem:[#allocation2 + $0xa0] sm:$0xff] %v2944_v31  }
 0x119   : > { %v842_v34 = vpop.f32.mrf.mxu2  ;;  %v882_v35 = vpop.f32.mrf.mxu3 }
 0x11a   : > { %v764_v36 = vpop.f32.mrf.mxu0  ;;  %v804_v37 = vpop.f32.mrf.mxu1 }
 0x11b   : > { %v2829_v38 = vpack.c.bf16 %v764_v36, %v762_v32  ;;  %v2869_v39 = vpack.c.bf16 %v804_v37, %v802_v33 }
 0x11d   : > { %2965 = vst [vmem:[#allocation2 + $0x68] sm:$0xff] %v2829_v38  }
 0x11e   : > { %2973 = vst [vmem:[#allocation2 + $0xf0] sm:$0xff] %v2869_v39  }
 0x121   : > { %v844_v40 = vpop.f32.mrf.mxu2  ;;  %v884_v41 = vpop.f32.mrf.mxu3 }
 0x122   : > { %v2909_v42 = vpack.c.bf16 %v844_v40, %v842_v34  ;;  %v2949_v43 = vpack.c.bf16 %v884_v41, %v882_v35  ;;  %v767_v44 = vpop.f32.mrf.mxu0  ;;  %v807_v45 = vpop.f32.mrf.mxu1 }
 0x124   : > { %2981 = vst [vmem:[#allocation2 + $0x90] sm:$0xff] %v2909_v42  }
 0x125   : > { %2989 = vst [vmem:[#allocation2 + $0xf8] sm:$0xff] %v2949_v43  }
 0x129   : > { %v847_v46 = vpop.f32.mrf.mxu2  ;;  %v887_v47 = vpop.f32.mrf.mxu3 }
 0x12a   : > { %v769_v48 = vpop.f32.mrf.mxu0  ;;  %v809_v49 = vpop.f32.mrf.mxu1 }
 0x12b   : > { %v2834_v50 = vpack.c.bf16 %v769_v48, %v767_v44  ;;  %v2874_v51 = vpack.c.bf16 %v809_v49, %v807_v45 }
 0x12d   : > { %2966 = vst [vmem:[#allocation2 + $0x30] sm:$0xff] %v2834_v50  }
 0x12e   : > { %2974 = vst [vmem:[#allocation2 + $0x8] sm:$0xff] %v2874_v51  }
 0x131   : > { %v849_v52 = vpop.f32.mrf.mxu2  ;;  %v889_v53 = vpop.f32.mrf.mxu3 }
 0x132   : > { %v2914_v54 = vpack.c.bf16 %v849_v52, %v847_v46  ;;  %v2954_v55 = vpack.c.bf16 %v889_v53, %v887_v47  ;;  %v772_v56 = vpop.f32.mrf.mxu0  ;;  %v812_v57 = vpop.f32.mrf.mxu1 }
 0x134   : > { %2982 = vst [vmem:[#allocation2 + $0x70] sm:$0xff] %v2914_v54  }
 0x135   : > { %2990 = vst [vmem:[#allocation2 + $0x20] sm:$0xff] %v2954_v55  }
 0x139   : > { %v852_v58 = vpop.f32.mrf.mxu2  ;;  %v892_v59 = vpop.f32.mrf.mxu3 }
 0x13a   : > { %v774_v60 = vpop.f32.mrf.mxu0  ;;  %v814_v61 = vpop.f32.mrf.mxu1 }
 0x13b   : > { %v2839_v62 = vpack.c.bf16 %v774_v60, %v772_v56  ;;  %v2879_v63 = vpack.c.bf16 %v814_v61, %v812_v57 }
 0x13d   : > { %2967 = vst [vmem:[#allocation2 + $0x48] sm:$0xff] %v2839_v62  }
 0x13e   : > { %2975 = vst [vmem:[#allocation2 + $0x78] sm:$0xff] %v2879_v63  }
 0x141   : > { %v854_v0 = vpop.f32.mrf.mxu2  ;;  %v894_v1 = vpop.f32.mrf.mxu3 }
 0x142   : > { %v2919_v2 = vpack.c.bf16 %v854_v0, %v852_v58  ;;  %v2959_v3 = vpack.c.bf16 %v894_v1, %v892_v59 }
 0x144   : > { %2983 = vst [vmem:[#allocation2 + $0xc0] sm:$0xff] %v2919_v2  }
 0x145   : > { %2991 = vst [vmem:[#allocation2 + $0x98] sm:$0xff] %v2959_v3  }
 0x146 PF: > { %v2758_v4 = vld [vmem:[#allocation2 + $0x48] sm:$0xff]  ;;  %v2766_v5 = vld [vmem:[#allocation2 + $0x78] sm:$0xff]  ;;  %v2757_v6 = vld [vmem:[#allocation2 + $0x30] sm:$0xff]  ;;  %s1830_s12 = sld [smem:[#allocation4]]  ;;  %s2799_s17 = sshll.u32 %s3291_s0, 7 }
 0x147   : > { %3004 = vmatpush.bf16.msra.mxu2 %v2758_v4  ;;  %3012 = vmatpush.bf16.msra.mxu3 %v2766_v5  ;;  %v2765_v7 = vld [vmem:[#allocation2 + $0x8] sm:$0xff]  ;;  %v2764_v9 = vld [vmem:[#allocation2 + $0xf0] sm:$0xff]  ;;  %v2763_v11 = vld [vmem:[#allocation2 + $0x60] sm:$0xff]  ;;  %s2038_s19 = scalar_lea.hbm %s3827_s9, %s2799_s17  ;;  %s2039_s30 = sshll.u32 %s3366_s14, 4  ;;  %s2040_s30 = int_to_ptr.vmem [resolvable:$true] %s2039_s30 }
 0x148   : > { %1477 = vmatpush.bf16.msra.mxu0 %v2758_v4  ;;  %1526 = vmatpush.bf16.msra.mxu1 %v2766_v5  ;;  %v2756_v8 = vld [vmem:[#allocation2 + $0x68] sm:$0xff]  ;;  %v2755_v10 = vld [vmem:[#allocation2 + $0x50] sm:$0xff]  ;;  %v2754_v12 = vld [vmem:[#allocation2 + $0x18] sm:$0xff]  ;;  %s2022_s25 = scalar_lea.sflag [#allocation7], %s3355_s21 }
 0x149   : > { %v2762_v13 = vld [vmem:[#allocation2 + $0xb8] sm:$0xff]  ;;  %v2761_v15 = vld [vmem:[#allocation2 + $0xe8] sm:$0xff]  ;;  %v2752_v16 = vld [vmem:[#allocation2] sm:$0xff] }
 0x14a   : > { %v2753_v14 = vld [vmem:[#allocation2 + $0xd8] sm:$0xff]  ;;  %v2760_v17 = vld [vmem:[#allocation2 + $0x88] sm:$0xff]  ;;  %v2751_v18 = vld [vmem:[#allocation2 + $0xb0] sm:$0xff] }
 0x14b   : > { %3005 = vmatpush.bf16.msra.mxu2 %v2757_v6  ;;  %3013 = vmatpush.bf16.msra.mxu3 %v2765_v7  ;;  %v2759_v19 = vld [vmem:[#allocation2 + $0x80] sm:$0xff]  ;;  %v2737_v21 = vld [vmem:[%s3359_s29 + $0x8c] sm:$0xf0]  ;;  %v2421_v23 = vld [vmem:[%s3359_s29 + $0x90] sm:$0xf0] }
 0x14c   : > { %1478 = vmatpush.bf16.msra.mxu0 %v2757_v6  ;;  %1527 = vmatpush.bf16.msra.mxu1 %v2765_v7  ;;  %v2419_v20 = vld [vmem:[%s3359_s29 + $0x80] sm:$0xf]  ;;  %v2735_v22 = vld [vmem:[%s3359_s29 + $0x84] sm:$0xf]  ;;  %v2782_v25 = vld [vmem:[#allocation2 + $0x98] sm:$0xff] }
 0x14d   : > { %v2774_v24 = vld [vmem:[#allocation2 + $0xc0] sm:$0xff]  ;;  %v2420_v26 = vor.u32 %v2737_v21, %v2419_v20  ;;  %v2424_v27 = vor.u32 %v2735_v22, %v2421_v23  ;;  %v2773_v28 = vld [vmem:[#allocation2 + $0x70] sm:$0xff]  ;;  %v2780_v31 = vld [vmem:[#allocation2 + $0xf8] sm:$0xff] }
 0x14e   : > { %v2781_v29 = vld [vmem:[#allocation2 + $0x20] sm:$0xff]  ;;  %v2772_v30 = vld [vmem:[#allocation2 + $0x90] sm:$0xff]  ;;  %v2770_v38 = vld [vmem:[#allocation2 + $0xc8] sm:$0xff] }
 0x14f   : > { %3006 = vmatpush.bf16.msra.mxu2 %v2756_v8  ;;  %3014 = vmatpush.bf16.msra.mxu3 %v2764_v9  ;;  %v2771_v32 = vld [vmem:[#allocation2 + $0xe0] sm:$0xff]  ;;  %v2741_v35 = vld [vmem:[%s3359_s29 + $0xac] sm:$0xf0]  ;;  %v2437_v37 = vld [vmem:[%s3359_s29 + $0xb0] sm:$0xf0] }
 0x150   : > { %1479 = vmatpush.bf16.msra.mxu0 %v2756_v8  ;;  %1528 = vmatpush.bf16.msra.mxu1 %v2764_v9  ;;  %v2779_v33 = vld [vmem:[#allocation2 + $0xa0] sm:$0xff]  ;;  %v2778_v39 = vld [vmem:[#allocation2 + $0x28] sm:$0xff]  ;;  %v2777_v43 = vld [vmem:[#allocation2 + $0x10] sm:$0xff] }
 0x151   : > { %v2435_v34 = vld [vmem:[%s3359_s29 + $0xa0] sm:$0xf]  ;;  %v2739_v36 = vld [vmem:[%s3359_s29 + $0xa4] sm:$0xf]  ;;  %v2768_v44 = vld [vmem:[#allocation2 + $0x58] sm:$0xff] }
 0x152   : > { %v2436_v40 = vor.u32 %v2741_v35, %v2435_v34  ;;  %v2440_v41 = vor.u32 %v2739_v36, %v2437_v37  ;;  %v2769_v42 = vld [vmem:[#allocation2 + $0x40] sm:$0xff]  ;;  %v2721_v46 = vld [vmem:[%s3359_s29 + $0xc] sm:$0xf0]  ;;  %v2357_v50 = vld [vmem:[%s3359_s29 + $0x10] sm:$0xf0] }
 0x153   : > { %3007 = vmatpush.bf16.msra.mxu2 %v2755_v10  ;;  %3015 = vmatpush.bf16.msra.mxu3 %v2763_v11  ;;  %v2355_v45 = vld [vmem:[%s3359_s29] sm:$0xf]  ;;  %v2776_v47 = vld [vmem:[#allocation2 + $0xd0] sm:$0xff]  ;;  %v2719_v49 = vld [vmem:[%s3359_s29 + $0x4] sm:$0xf] }
 0x154   : > { %1480 = vmatpush.bf16.msra.mxu0 %v2755_v10  ;;  %1529 = vmatpush.bf16.msra.mxu1 %v2763_v11  ;;  %v2356_v48 = vor.u32 %v2721_v46, %v2355_v45  ;;  %v2360_v51 = vor.u32 %v2719_v49, %v2357_v50  ;;  %v2767_v52 = vld [vmem:[#allocation2 + $0x38] sm:$0xff]  ;;  %v2775_v53 = vld [vmem:[#allocation2 + $0xa8] sm:$0xff]  ;;  %v2451_v54 = vld [vmem:[%s3359_s29 + $0xc0] sm:$0xf] }
 0x155   : > { %v2745_v55 = vld [vmem:[%s3359_s29 + $0xcc] sm:$0xf0]  ;;  %v2743_v56 = vld [vmem:[%s3359_s29 + $0xc4] sm:$0xf]  ;;  %v2453_v57 = vld [vmem:[%s3359_s29 + $0xd0] sm:$0xf0] }
 0x156   : > { %v2452_v58 = vor.u32 %v2745_v55, %v2451_v54  ;;  %v2456_v59 = vor.u32 %v2743_v56, %v2453_v57  ;;  %v2371_v60 = vld [vmem:[%s3359_s29 + $0x20] sm:$0xf]  ;;  %v2725_v61 = vld [vmem:[%s3359_s29 + $0x2c] sm:$0xf0]  ;;  %v2723_v62 = vld [vmem:[%s3359_s29 + $0x24] sm:$0xf] }
 0x157   : > { %3008 = vmatpush.bf16.msra.mxu2 %v2754_v12  ;;  %3016 = vmatpush.bf16.msra.mxu3 %v2762_v13  ;;  %v2372_v63 = vor.u32 %v2725_v61, %v2371_v60  ;;  %v2373_v0 = vld [vmem:[%s3359_s29 + $0x30] sm:$0xf0]  ;;  %v2467_v2 = vld [vmem:[%s3359_s29 + $0xe0] sm:$0xf]  ;;  %v2749_v3 = vld [vmem:[%s3359_s29 + $0xec] sm:$0xf0] }
 0x158   : > { %1481 = vmatpush.bf16.msra.mxu0 %v2754_v12  ;;  %1530 = vmatpush.bf16.msra.mxu1 %v2762_v13  ;;  %v2376_v1 = vor.u32 %v2723_v62, %v2373_v0  ;;  %v2747_v4 = vld [vmem:[%s3359_s29 + $0xe4] sm:$0xf]  ;;  %v2469_v5 = vld [vmem:[%s3359_s29 + $0xf0] sm:$0xf0]  ;;  %v2468_v6 = vor.u32 %v2749_v3, %v2467_v2  ;;  %v2387_v8 = vld [vmem:[%s3359_s29 + $0x40] sm:$0xf] }
 0x159   : > { %v2472_v7 = vor.u32 %v2747_v4, %v2469_v5  ;;  %v2729_v9 = vld [vmem:[%s3359_s29 + $0x4c] sm:$0xf0]  ;;  %v2727_v10 = vld [vmem:[%s3359_s29 + $0x44] sm:$0xf]  ;;  %v2389_v12 = vld [vmem:[%s3359_s29 + $0x50] sm:$0xf0] }
 0x15a   : > { %v2388_v11 = vor.u32 %v2729_v9, %v2387_v8  ;;  %v2392_v13 = vor.u32 %v2727_v10, %v2389_v12  ;;  %v2403_v20 = vld [vmem:[%s3359_s29 + $0x60] sm:$0xf]  ;;  %v2733_v21 = vld [vmem:[%s3359_s29 + $0x6c] sm:$0xf0]  ;;  %v2731_v22 = vld [vmem:[%s3359_s29 + $0x64] sm:$0xf] }
 0x15b   : > { %3009 = vmatpush.bf16.msra.mxu2 %v2753_v14  ;;  %3017 = vmatpush.bf16.msra.mxu3 %v2761_v15  ;;  %v2404_v23 = vor.u32 %v2733_v21, %v2403_v20  ;;  %v2728_v34 = vld [vmem:[%s3359_s29 + $0x4c] sm:$0xf]  ;;  %v2397_v35 = vld [vmem:[%s3359_s29 + $0x58] sm:$0xf0]  ;;  %v2427_v45 = vld [vmem:[%s3359_s29 + $0x88] sm:$0xf] }
 0x15c   : > { %1482 = vmatpush.bf16.msra.mxu0 %v2753_v14  ;;  %1531 = vmatpush.bf16.msra.mxu1 %v2761_v15  ;;  %v2363_v14 = vld [vmem:[%s3359_s29 + $0x8] sm:$0xf]  ;;  %v2722_v15 = vld [vmem:[%s3359_s29 + $0x14] sm:$0xf0]  ;;  %v2400_v37 = vor.u32 %v2728_v34, %v2397_v35  ;;  %v2740_v60 = vld [vmem:[%s3359_s29 + $0xac] sm:$0xf] }
 0x15d   : > { %v2738_v46 = vld [vmem:[%s3359_s29 + $0x94] sm:$0xf0]  ;;  %v2788_v57 = vld [vmem:[%s3823_s5 + $0x28] sm:$0xff]  ;;  %v2445_v61 = vld [vmem:[%s3359_s29 + $0xb8] sm:$0xf0] }
 0x15e   : > { %v2428_v49 = vor.u32 %v2738_v46, %v2427_v45  ;;  %v2448_v2 = vor.u32 %v2740_v60, %v2445_v61  ;;  %v2787_v4 = vld [vmem:[%s3823_s5 + $0x20] sm:$0xff]  ;;  %v2786_v9 = vld [vmem:[%s3823_s5 + $0x18] sm:$0xff]  ;;  %v2459_v10 = vld [vmem:[%s3359_s29 + $0xc8] sm:$0xf] }
 0x15f   : > { %3010 = vmatpush.bf16.msra.mxu2 %v2752_v16  ;;  %3018 = vmatpush.bf16.msra.mxu3 %v2760_v17  ;;  %v2744_v12 = vld [vmem:[%s3359_s29 + $0xcc] sm:$0xf]  ;;  %v2785_v20 = vld [vmem:[%s3823_s5 + $0x10] sm:$0xff] }
 0x160   : > { %1483 = vmatpush.bf16.msra.mxu0 %v2752_v16  ;;  %1532 = vmatpush.bf16.msra.mxu1 %v2760_v17  ;;  %v2720_v16 = vld [vmem:[%s3359_s29 + $0xc] sm:$0xf]  ;;  %v2365_v17 = vld [vmem:[%s3359_s29 + $0x18] sm:$0xf0] }
 0x163   : > { %3011 = vmatpush.bf16.msra.mxu2 %v2751_v18  ;;  %3019 = vmatpush.bf16.msra.mxu3 %v2759_v19 }
 0x164   : > { %1484 = vmatpush.bf16.msra.mxu0 %v2751_v18  ;;  %1533 = vmatpush.bf16.msra.mxu1 %v2759_v19  ;;  %v2364_v18 = vor.u32 %v2722_v15, %v2363_v14  ;;  %v2368_v19 = vor.u32 %v2720_v16, %v2365_v17 }
 0x166   : > { %1505 = vmatmul.bf16.vlgmr.msra.gmra.mxu2 %v2420_v26  ;;  %1554 = vmatmul.bf16.vlgmr.msra.gmra.mxu3 %v2424_v27  ;;  %v2379_v26 = vld [vmem:[%s3359_s29 + $0x28] sm:$0xf]  ;;  %v2726_v27 = vld [vmem:[%s3359_s29 + $0x34] sm:$0xf0] }
 0x167   : > { %1575 = vmatpush.bf16.msrb.mxu2 %v2774_v24  ;;  %1624 = vmatpush.bf16.msrb.mxu3 %v2782_v25  ;;  %v2405_v24 = vld [vmem:[%s3359_s29 + $0x70] sm:$0xf0] }
 0x168   : > { %1485 = vmatmul.bf16.vlgmr.msra.gmra.mxu0 %v2356_v48  ;;  %1534 = vmatmul.bf16.vlgmr.msra.gmra.mxu1 %v2360_v51  ;;  %v2408_v25 = vor.u32 %v2731_v22, %v2405_v24  ;;  %v2429_v48 = vld [vmem:[%s3359_s29 + $0x98] sm:$0xf0]  ;;  %v2789_v51 = vld [vmem:[%s3823_s5 + $0x30] sm:$0xff] }
 0x16b   : > { %1576 = vmatpush.bf16.msrb.mxu2 %v2773_v28  ;;  %1625 = vmatpush.bf16.msrb.mxu3 %v2781_v29  ;;  %v2724_v28 = vld [vmem:[%s3359_s29 + $0x2c] sm:$0xf]  ;;  %v2381_v29 = vld [vmem:[%s3359_s29 + $0x38] sm:$0xf0] }
 0x16f   : > { %1577 = vmatpush.bf16.msrb.mxu2 %v2772_v30  ;;  %1626 = vmatpush.bf16.msrb.mxu3 %v2780_v31  ;;  %v2380_v30 = vor.u32 %v2726_v27, %v2379_v26  ;;  %v2384_v31 = vor.u32 %v2724_v28, %v2381_v29  ;;  %v2750_v26 = vld [vmem:[%s3359_s29 + $0xf4] sm:$0xf0]  ;;  %v2748_v27 = vld [vmem:[%s3359_s29 + $0xec] sm:$0xf]  ;;  %v2477_v28 = vld [vmem:[%s3359_s29 + $0xf8] sm:$0xf0] }
 0x170   : > { %v2784_v29 = vld [vmem:[%s3823_s5 + $0x8] sm:$0xff]  ;;  %v2480_v34 = vor.u32 %v2748_v27, %v2477_v28 }
 0x173   : > { %1578 = vmatpush.bf16.msrb.mxu2 %v2771_v32  ;;  %1627 = vmatpush.bf16.msrb.mxu3 %v2779_v33  ;;  %v2395_v32 = vld [vmem:[%s3359_s29 + $0x48] sm:$0xf]  ;;  %v2730_v33 = vld [vmem:[%s3359_s29 + $0x54] sm:$0xf0] }
 0x174   : > { %v2396_v36 = vor.u32 %v2730_v33, %v2395_v32 }
 0x176   : > { %1510 = vmatmul.bf16.gmra.mxu2 %v2436_v40  ;;  %1559 = vmatmul.bf16.gmra.mxu3 %v2440_v41  ;;  %v2732_v40 = vld [vmem:[%s3359_s29 + $0x6c] sm:$0xf]  ;;  %v2413_v41 = vld [vmem:[%s3359_s29 + $0x78] sm:$0xf0] }
 0x177   : > { %1579 = vmatpush.bf16.msrb.mxu2 %v2770_v38  ;;  %1628 = vmatpush.bf16.msrb.mxu3 %v2778_v39  ;;  %v2411_v38 = vld [vmem:[%s3359_s29 + $0x68] sm:$0xf]  ;;  %v2734_v39 = vld [vmem:[%s3359_s29 + $0x74] sm:$0xf0] }
 0x178   : > { %1490 = vmatmul.bf16.gmra.mxu0 %v2372_v63  ;;  %1539 = vmatmul.bf16.gmra.mxu1 %v2376_v1 }
 0x17b   : > { %1580 = vmatpush.bf16.msrb.mxu2 %v2769_v42  ;;  %1629 = vmatpush.bf16.msrb.mxu3 %v2777_v43  ;;  %v2412_v42 = vor.u32 %v2734_v39, %v2411_v38  ;;  %v2416_v43 = vor.u32 %v2732_v40, %v2413_v41 }
 0x17f   : > { %1581 = vmatpush.bf16.msrb.mxu2 %v2768_v44  ;;  %1630 = vmatpush.bf16.msrb.mxu3 %v2776_v47  ;;  %v2790_v44 = vld [vmem:[%s3823_s5 + $0x38] sm:$0xff]  ;;  %v2736_v47 = vld [vmem:[%s3359_s29 + $0x8c] sm:$0xf] }
 0x180   : > { %1781 = vmatpush.bf16.msrb.mxu0 %v2790_v44  ;;  %v2432_v50 = vor.u32 %v2736_v47, %v2429_v48 }
 0x183   : > { %1582 = vmatpush.bf16.msrb.mxu2 %v2767_v52  ;;  %1631 = vmatpush.bf16.msrb.mxu3 %v2775_v53  ;;  %v3572_v52 = vld [vmem:[%s3822_s4] ss:$0 sm:$0xff] }
 0x184   : > { %1782 = vmatpush.bf16.msrb.mxu0 %v2789_v51 }
 0x186   : > { %1515 = vmatmul.bf16.gmra.mxu2 %v2452_v58  ;;  %1564 = vmatmul.bf16.gmra.mxu3 %v2456_v59  ;;  %v2443_v58 = vld [vmem:[%s3359_s29 + $0xa8] sm:$0xf]  ;;  %v2742_v59 = vld [vmem:[%s3359_s29 + $0xb4] sm:$0xf0] }
 0x187   : > { %v2444_v1 = vor.u32 %v2742_v59, %v2443_v58 }
 0x188   : > { %1495 = vmatmul.bf16.gmra.mxu0 %v2388_v11  ;;  %1544 = vmatmul.bf16.gmra.mxu1 %v2392_v13  ;;  %v2746_v11 = vld [vmem:[%s3359_s29 + $0xd4] sm:$0xf0]  ;;  %v2461_v13 = vld [vmem:[%s3359_s29 + $0xd8] sm:$0xf0] }
 0x189   : > { %1783 = vmatpush.bf16.msrb.mxu0 %v2788_v57  ;;  %v2460_v17 = vor.u32 %v2746_v11, %v2459_v10 }
 0x18d   : > { %1784 = vmatpush.bf16.msrb.mxu0 %v2787_v4 }
 0x191   : > { %1785 = vmatpush.bf16.msrb.mxu0 %v2786_v9 }
 0x195   : > { %1786 = vmatpush.bf16.msrb.mxu0 %v2785_v20 }
 0x196   : > { %1520 = vmatmul.bf16.gmra.mxu2 %v2468_v6  ;;  %1569 = vmatmul.bf16.gmra.mxu3 %v2472_v7 }
 0x198   : > { %1500 = vmatmul.bf16.gmra.mxu0 %v2404_v23  ;;  %1549 = vmatmul.bf16.gmra.mxu1 %v2408_v25  ;;  %v2475_v25 = vld [vmem:[%s3359_s29 + $0xe8] sm:$0xf]  ;;  %s2041_s29 = sshll.u32 %s2038_s19, 4  ;;  %s2042_s29 = int_to_ptr.hbm [resolvable:$true] %s2041_s29 }
 0x199   : > { %v2476_v33 = vor.u32 %v2750_v26, %v2475_v25  ;;  %1787 = vmatpush.bf16.msrb.mxu0 %v2784_v29 }
 0x1a6   : > { %1583 = vmatmul.bf16.vlgmr.msrb.gmra.mxu2 %v2364_v18  ;;  %1632 = vmatmul.bf16.vlgmr.msrb.gmra.mxu3 %v2368_v19  ;;  %v2464_v18 = vor.u32 %v2744_v12, %v2461_v13 }
 0x1b6   : > { %1588 = vmatmul.bf16.gmra.mxu2 %v2380_v30  ;;  %1637 = vmatmul.bf16.gmra.mxu3 %v2384_v31 }
 0x1c6   : > { %1593 = vmatmul.bf16.gmra.mxu2 %v2396_v36  ;;  %1642 = vmatmul.bf16.gmra.mxu3 %v2400_v37  ;;  %v2783_v37 = vld [vmem:[%s3823_s5] sm:$0xff] }
 0x1c7   : > { %1788 = vmatpush.bf16.msrb.mxu0 %v2783_v37 }
 0x1d6   : > { %1598 = vmatmul.bf16.gmra.mxu2 %v2412_v42  ;;  %1647 = vmatmul.bf16.gmra.mxu3 %v2416_v43 }
 0x1e5   : > { %v1486_v35 = vpop.f32.mrf.mxu0  ;;  %v1535_v38 = vpop.f32.mrf.mxu1 }
 0x1e6   : > { %1603 = vmatmul.bf16.gmra.mxu2 %v2428_v49  ;;  %1652 = vmatmul.bf16.gmra.mxu3 %v2432_v50  ;;  %v1487_v47 = vadd.f32 %v3572_v52, %v1486_v35 }
 0x1e8   : > { %v1536_v50 = vadd.f32 %v1535_v38, %v1487_v47 }
 0x1e9   : > { %v1506_v53 = vpop.f32.mrf.mxu2  ;;  %v1555_v54 = vpop.f32.mrf.mxu3 }
 0x1ea   : > { %v1507_v55 = vadd.f32 %v3572_v52, %v1506_v53 }
 0x1ec   : > { %v3575_v56 = vadd.f32 %v1555_v54, %v1507_v55 }
 0x1ed   : > { %v1488_v43 = vpop.f32.mrf.mxu0  ;;  %v1537_v44 = vpop.f32.mrf.mxu1 }
 0x1ee   : > { %v1489_v58 = vadd.f32 %v3572_v52, %v1488_v43 }
 0x1f0   : > { %v1538_v61 = vadd.f32 %v1537_v44, %v1489_v58 }
 0x1f1   : > { %v1508_v62 = vpop.f32.mrf.mxu2  ;;  %v1557_v63 = vpop.f32.mrf.mxu3 }
 0x1f2   : > { %v1509_v0 = vadd.f32 %v3572_v52, %v1508_v62 }
 0x1f4   : > { %v3585_v3 = vadd.f32 %v1557_v63, %v1509_v0 }
 0x1f5   : > { %v1491_v51 = vpop.f32.mrf.mxu0  ;;  %v1540_v57 = vpop.f32.mrf.mxu1 }
 0x1f6   : > { %1608 = vmatmul.bf16.gmra.mxu2 %v2444_v1  ;;  %1657 = vmatmul.bf16.gmra.mxu3 %v2448_v2  ;;  %v1492_v1 = vadd.f32 %v3572_v52, %v1491_v51 }
 0x1f9   : > { %v1511_v5 = vpop.f32.mrf.mxu2  ;;  %v1560_v6 = vpop.f32.mrf.mxu3 }
 0x1fa   : > { %v1512_v7 = vadd.f32 %v3572_v52, %v1511_v5 }
 0x1fc   : > { %v3591_v8 = vadd.f32 %v1560_v6, %v1512_v7  ;;  %v1541_v6 = vadd.f32 %v1540_v57, %v1492_v1 }
 0x1fd   : > { %v1493_v62 = vpop.f32.mrf.mxu0  ;;  %v1542_v5 = vpop.f32.mrf.mxu1 }
 0x201   : > { %v1513_v14 = vpop.f32.mrf.mxu2  ;;  %v1562_v15 = vpop.f32.mrf.mxu3 }
 0x202   : > { %v1514_v16 = vadd.f32 %v3572_v52, %v1513_v14  ;;  %v1494_v14 = vadd.f32 %v3572_v52, %v1493_v62 }
 0x204   : > { %v3601_v19 = vadd.f32 %v1562_v15, %v1514_v16 }
 0x205   : > { %v1496_v13 = vpop.f32.mrf.mxu0 }
 0x206   : > { %1613 = vmatmul.bf16.gmra.mxu2 %v2460_v17  ;;  %1662 = vmatmul.bf16.gmra.mxu3 %v2464_v18  ;;  %v1545_v17 = vpop.f32.mrf.mxu1  ;;  %v1543_v18 = vadd.f32 %v1542_v5, %v1494_v14  ;;  %v2798_v5 = vld [vmem:[%s3825_s7 + $0x38] sm:$0xff] }
 0x207   : > { %1956 = vmatpush.bf16.msrb.mxu1 %v2798_v5 }
 0x209   : > { %v1516_v21 = vpop.f32.mrf.mxu2  ;;  %v1565_v22 = vpop.f32.mrf.mxu3 }
 0x20a   : > { %v1517_v23 = vadd.f32 %v3572_v52, %v1516_v21 }
 0x20c   : > { %v3607_v24 = vadd.f32 %v1565_v22, %v1517_v23  ;;  %v1497_v22 = vadd.f32 %v3572_v52, %v1496_v13 }
 0x20d   : > { %v1498_v26 = vpop.f32.mrf.mxu0 }
 0x20e   : > { %v1546_v27 = vadd.f32 %v1545_v17, %v1497_v22  ;;  %v1547_v29 = vpop.f32.mrf.mxu1 }
 0x211   : > { %v1518_v30 = vpop.f32.mrf.mxu2  ;;  %v1567_v31 = vpop.f32.mrf.mxu3 }
 0x212   : > { %v1519_v32 = vadd.f32 %v3572_v52, %v1518_v30 }
 0x214   : > { %v3617_v36 = vadd.f32 %v1567_v31, %v1519_v32 }
 0x215   : > { %v1501_v38 = vpop.f32.mrf.mxu0 }
 0x216   : > { %1618 = vmatmul.bf16.gmra.mxu2 %v2476_v33  ;;  %1667 = vmatmul.bf16.gmra.mxu3 %v2480_v34  ;;  %v1499_v34 = vadd.f32 %v3572_v52, %v1498_v26  ;;  %v1502_v43 = vadd.f32 %v3572_v52, %v1501_v38 }
 0x219   : > { %v1521_v39 = vpop.f32.mrf.mxu2  ;;  %v1570_v40 = vpop.f32.mrf.mxu3 }
 0x21a   : > { %v1522_v41 = vadd.f32 %v3572_v52, %v1521_v39  ;;  %v1548_v39 = vadd.f32 %v1547_v29, %v1499_v34 }
 0x21c   : > { %v3623_v42 = vadd.f32 %v1570_v40, %v1522_v41 }
 0x221   : > { %v1523_v45 = vpop.f32.mrf.mxu2  ;;  %v1572_v46 = vpop.f32.mrf.mxu3 }
 0x222   : > { %v1524_v48 = vadd.f32 %v3572_v52, %v1523_v45  ;;  %v1550_v45 = vpop.f32.mrf.mxu1 }
 0x223   : > { %v1551_v47 = vadd.f32 %v1550_v45, %v1502_v43 }
 0x224   : > { %v3627_v49 = vadd.f32 %v1572_v46, %v1524_v48 }
 0x229   : > { %v1584_v53 = vpop.f32.mrf.mxu2  ;;  %v1633_v54 = vpop.f32.mrf.mxu3 }
 0x22a   : > { %v1585_v55 = vadd.f32 %v1584_v53, %v1536_v50  ;;  %v1503_v50 = vpop.f32.mrf.mxu0 }
 0x22b   : > { %v1504_v57 = vadd.f32 %v3572_v52, %v1503_v50 }
 0x22c   : > { %v1634_v59 = vadd.f32 %v1633_v54, %v1585_v55 }
 0x22e   : > { %v1673_v60 = vmax.f32 %v1634_v59, 0.0  ;;  %v1552_v59 = vpop.f32.mrf.mxu1 }
 0x230   : > { %1689 = vst [vmem:[%s3366_s14] sm:$0xff] %v1673_v60 }
 0x231   : > { %v1586_v63 = vpop.f32.mrf.mxu2  ;;  %v1635_v0 = vpop.f32.mrf.mxu3 }
 0x232   : > { %v1587_v2 = vadd.f32 %v1586_v63, %v1538_v61  ;;  %v1553_v61 = vadd.f32 %v1552_v59, %v1504_v57  ;;  %v3690_v59 = vstv %s1830_s12  ;;  %s3122_s12 = sshra.s32 %s2042_s29, 4  ;;  %s3123_s12 = int_to_ptr.hbm [resolvable:$true] %s3122_s12 }
 0x233   : > { %s3124_s28 = scalar_lea.hbm %s3123_s12, 128  ;;  %p3129_p2 = scmp.lt.s32.totalorder %s3123_s12, %s3827_s9 }
 0x234   : > { %v1636_v4 = vadd.f32 %v1635_v0, %v1587_v2  ;;  %p3125_p6 = scmp.ne.s32.totalorder %s3123_s12, %s3124_s28 }
 0x236   : > { %v1674_v7 = vmax.f32 %v1636_v4, 0.0  ;;  %p3126_p13 = pnand %p3125_p6, %p3319_p10 }
 0x238   : > { %1690 = vst [vmem:[%s3366_s14 + $0x8] sm:$0xff] %v1674_v7  ;;  %v1705_v9 = vpack.c.bf16 %v1674_v7, %v1673_v60  ;;  %p3127_p0 = pneg %p3126_p13 }
 0x239   : > { %v1589_v10 = vpop.f32.mrf.mxu2  ;;  %v1638_v11 = vpop.f32.mrf.mxu3 }
 0x23a   : > { %v1590_v12 = vadd.f32 %v1589_v10, %v1541_v6  ;;  %1789 = vmatmul.bf16.vlgmr.msrb.gmra.mxu0 %v1705_v9 }
 0x23c   : > { %v1639_v15 = vadd.f32 %v1638_v11, %v1590_v12  ;;  %v2797_v11 = vld [vmem:[%s3825_s7 + $0x30] sm:$0xff] }
 0x23d   : > { %1957 = vmatpush.bf16.msrb.mxu1 %v2797_v11 }
 0x23e   : > { %v1675_v16 = vmax.f32 %v1639_v15, 0.0 }
 0x240   : > { %1691 = vst [vmem:[%s3366_s14 + $0x10] sm:$0xff] %v1675_v16 }
 0x241   : > { %v1591_v20 = vpop.f32.mrf.mxu2  ;;  %v1640_v21 = vpop.f32.mrf.mxu3 }
 0x242   : > { %v1592_v23 = vadd.f32 %v1591_v20, %v1543_v18 }
 0x244   : > { %v1641_v25 = vadd.f32 %v1640_v21, %v1592_v23 }
 0x246   : > { %v1676_v28 = vmax.f32 %v1641_v25, 0.0 }
 0x248   : > { %1692 = vst [vmem:[%s3366_s14 + $0x18] sm:$0xff] %v1676_v28  ;;  %v1706_v30 = vpack.c.bf16 %v1676_v28, %v1675_v16 }
 0x249   : > { %v1594_v31 = vpop.f32.mrf.mxu2  ;;  %v1643_v32 = vpop.f32.mrf.mxu3 }
 0x24a   : > { %v1595_v33 = vadd.f32 %v1594_v31, %v1546_v27  ;;  %1794 = vmatmul.bf16.gmra.mxu0 %v1706_v30 }
 0x24c   : > { %v1644_v35 = vadd.f32 %v1643_v32, %v1595_v33 }
 0x24e   : > { %v1677_v37 = vmax.f32 %v1644_v35, 0.0 }
 0x250   : > { %1693 = vst [vmem:[%s3366_s14 + $0x20] sm:$0xff] %v1677_v37 }
 0x251   : > { %v1596_v40 = vpop.f32.mrf.mxu2  ;;  %v1645_v41 = vpop.f32.mrf.mxu3 }
 0x252   : > { %v1597_v44 = vadd.f32 %v1596_v40, %v1548_v39 }
 0x254   : > { %v1646_v46 = vadd.f32 %v1645_v41, %v1597_v44 }
 0x256   : > { %v1678_v48 = vmax.f32 %v1646_v46, 0.0  ;;  %v2792_v46 = vld [vmem:[%s3825_s7 + $0x8] sm:$0xff] }
 0x258   : > { %1694 = vst [vmem:[%s3366_s14 + $0x28] sm:$0xff] %v1678_v48  ;;  %v1707_v51 = vpack.c.bf16 %v1678_v48, %v1677_v37 }
 0x259   : > { %v1599_v53 = vpop.f32.mrf.mxu2  ;;  %v1648_v54 = vpop.f32.mrf.mxu3 }
 0x25a   : > { %v1600_v55 = vadd.f32 %v1599_v53, %v1551_v47  ;;  %1799 = vmatmul.bf16.gmra.mxu0 %v1707_v51  ;;  %v2791_v51 = vld [vmem:[%s3825_s7] sm:$0xff] }
 0x25c   : > { %v1649_v58 = vadd.f32 %v1648_v54, %v1600_v55 }
 0x25e   : > { %v1679_v60 = vmax.f32 %v1649_v58, 0.0  ;;  %v3687_v58 = vld [vmem:[%s3824_s6] ss:$0 sm:$0xff] }
 0x260   : > { %1695 = vst [vmem:[%s3366_s14 + $0x30] sm:$0xff] %v1679_v60 }
 0x261   : > { %v1601_v62 = vpop.f32.mrf.mxu2  ;;  %v1650_v63 = vpop.f32.mrf.mxu3 }
 0x262   : > { %v1602_v0 = vadd.f32 %v1601_v62, %v1553_v61 }
 0x264   : > { %v1651_v1 = vadd.f32 %v1650_v63, %v1602_v0 }
 0x266   : > { %v1680_v2 = vmax.f32 %v1651_v1, 0.0 }
 0x268   : > { %1696 = vst [vmem:[%s3366_s14 + $0x38] sm:$0xff] %v1680_v2  ;;  %v1708_v4 = vpack.c.bf16 %v1680_v2, %v1679_v60 }
 0x269   : > { %v1604_v6 = vpop.f32.mrf.mxu2  ;;  %v1653_v52 = vpop.f32.mrf.mxu3 }
 0x26a   : > { %v1605_v7 = vadd.f32 %v1604_v6, %v3575_v56  ;;  %1804 = vmatmul.bf16.gmra.mxu0 %v1708_v4  ;;  %v2796_v56 = vld [vmem:[%s3825_s7 + $0x28] sm:$0xff] }
 0x26b   : > { %1958 = vmatpush.bf16.msrb.mxu1 %v2796_v56 }
 0x26c   : > { %v1654_v9 = vadd.f32 %v1653_v52, %v1605_v7 }
 0x26e   : > { %v1681_v10 = vmax.f32 %v1654_v9, 0.0 }
 0x270   : > { %1697 = vst [vmem:[%s3366_s14 + $0x40] sm:$0xff] %v1681_v10 }
 0x271   : > { %v1606_v12 = vpop.f32.mrf.mxu2  ;;  %v1655_v13 = vpop.f32.mrf.mxu3 }
 0x272   : > { %v1607_v14 = vadd.f32 %v1606_v12, %v3585_v3  ;;  %v2795_v3 = vld [vmem:[%s3825_s7 + $0x20] sm:$0xff] }
 0x273   : > { %1959 = vmatpush.bf16.msrb.mxu1 %v2795_v3 }
 0x274   : > { %v1656_v15 = vadd.f32 %v1655_v13, %v1607_v14 }
 0x276   : > { %v1682_v16 = vmax.f32 %v1656_v15, 0.0 }
 0x278   : > { %1698 = vst [vmem:[%s3366_s14 + $0x48] sm:$0xff] %v1682_v16  ;;  %v1709_v17 = vpack.c.bf16 %v1682_v16, %v1681_v10 }
 0x279   : > { %v1609_v18 = vpop.f32.mrf.mxu2  ;;  %v1658_v20 = vpop.f32.mrf.mxu3 }
 0x27a   : > { %v1610_v21 = vadd.f32 %v1609_v18, %v3591_v8  ;;  %1809 = vmatmul.bf16.gmra.mxu0 %v1709_v17  ;;  %v2794_v8 = vld [vmem:[%s3825_s7 + $0x18] sm:$0xff] }
 0x27b   : > { %1960 = vmatpush.bf16.msrb.mxu1 %v2794_v8 }
 0x27c   : > { %v1659_v22 = vadd.f32 %v1658_v20, %v1610_v21 }
 0x27e   : > { %v1683_v23 = vmax.f32 %v1659_v22, 0.0 }
 0x280   : > { %1699 = vst [vmem:[%s3366_s14 + $0x50] sm:$0xff] %v1683_v23 }
 0x281   : > { %v1611_v25 = vpop.f32.mrf.mxu2  ;;  %v1660_v26 = vpop.f32.mrf.mxu3 }
 0x282   : > { %v1612_v27 = vadd.f32 %v1611_v25, %v3601_v19  ;;  %v2793_v19 = vld [vmem:[%s3825_s7 + $0x10] sm:$0xff] }
 0x283   : > { %1961 = vmatpush.bf16.msrb.mxu1 %v2793_v19 }
 0x284   : > { %v1661_v28 = vadd.f32 %v1660_v26, %v1612_v27 }
 0x286   : > { %v1684_v29 = vmax.f32 %v1661_v28, 0.0 }
 0x287   : > { %1962 = vmatpush.bf16.msrb.mxu1 %v2792_v46 }
 0x288   : > { %1700 = vst [vmem:[%s3366_s14 + $0x58] sm:$0xff] %v1684_v29  ;;  %v1710_v30 = vpack.c.bf16 %v1684_v29, %v1683_v23 }
 0x289   : > { %v1614_v31 = vpop.f32.mrf.mxu2  ;;  %v1663_v32 = vpop.f32.mrf.mxu3 }
 0x28a   : > { %v1615_v33 = vadd.f32 %v1614_v31, %v3607_v24  ;;  %1814 = vmatmul.bf16.gmra.mxu0 %v1710_v30 }
 0x28b   : > { %1963 = vmatpush.bf16.msrb.mxu1 %v2791_v51 }
 0x28c   : > { %v1664_v34 = vadd.f32 %v1663_v32, %v1615_v33 }
 0x28e   : > { %v1685_v35 = vmax.f32 %v1664_v34, 0.0 }
 0x290   : > { %1701 = vst [vmem:[%s3366_s14 + $0x60] sm:$0xff] %v1685_v35 }
 0x291   : > { %v1616_v37 = vpop.f32.mrf.mxu2  ;;  %v1665_v38 = vpop.f32.mrf.mxu3 }
 0x292   : > { %v1617_v39 = vadd.f32 %v1616_v37, %v3617_v36 }
 0x294   : > { %v1666_v40 = vadd.f32 %v1665_v38, %v1617_v39 }
 0x296   : > { %v1686_v41 = vmax.f32 %v1666_v40, 0.0 }
 0x298   : > { %1702 = vst [vmem:[%s3366_s14 + $0x68] sm:$0xff] %v1686_v41  ;;  %v1711_v43 = vpack.c.bf16 %v1686_v41, %v1685_v35 }
 0x299   : > { %v1619_v24 = vpop.f32.mrf.mxu2  ;;  %v1668_v44 = vpop.f32.mrf.mxu3 }
 0x29a   : > { %v1620_v45 = vadd.f32 %v1619_v24, %v3623_v42  ;;  %1819 = vmatmul.bf16.gmra.mxu0 %v1711_v43 }
 0x29c   : > { %v1669_v47 = vadd.f32 %v1668_v44, %v1620_v45 }
 0x29e   : > { %v1687_v48 = vmax.f32 %v1669_v47, 0.0 }
 0x2a0   : > { %1703 = vst [vmem:[%s3366_s14 + $0x70] sm:$0xff] %v1687_v48 }
 0x2a1   : > { %v1621_v50 = vpop.f32.mrf.mxu2  ;;  %v1670_v53 = vpop.f32.mrf.mxu3 }
 0x2a2   : > { %v1622_v36 = vadd.f32 %v1621_v50, %v3627_v49 }
 0x2a4   : > { %v1671_v54 = vadd.f32 %v1670_v53, %v1622_v36 }
 0x2a6   : > { %v1688_v42 = vmax.f32 %v1671_v54, 0.0 }
 0x2a8   : > { %1704 = vst [vmem:[%s3366_s14 + $0x78] sm:$0xff] %v1688_v42  ;;  %v1712_v55 = vpack.c.bf16 %v1688_v42, %v1687_v48  ;;  %s3128_s14 = scalar_lea.hbm %s3827_s9, 512 }
 0x2a9   : > { %p3130_p3 = scmp.lt.s32.totalorder %s3128_s14, %s3124_s28 }
 0x2aa   : > { %1824 = vmatmul.bf16.gmra.mxu0 %v1712_v55 }
 0x2ab   : > { %p3131_p4 = por %p3130_p3, %p3129_p2 }
 0x2ad   : > { %p3132_p5 = pnand %p3131_p4, %p3127_p0 }
 0x2b7   : > { %v1790_v57 = vpop.f32.mrf.mxu0 }
 0x2b8   : > { %v1791_v49 = vadd.f32 %v3687_v58, %v1790_v57 }
 0x2ba   : > { %v1848_v61 = vmul.f32 %v3690_v59, %v1791_v49  ;;  %vm1831_vm1 = vcmp.ge.f32.partialorder %v1791_v49, 0.0 }
 0x2bc   : > { %v1864_v0 = vsel %vm1831_vm1, %v1791_v49, %v1848_v61 }
 0x2bf   : > { %v1792_v60 = vpop.f32.mrf.mxu0 }
 0x2c0   : > { %v1793_v62 = vadd.f32 %v3687_v58, %v1792_v60 }
 0x2c2   : > { %vm1832_vm2 = vcmp.ge.f32.partialorder %v1793_v62, 0.0  ;;  %v1849_v63 = vmul.f32 %v3690_v59, %v1793_v62 }
 0x2c4   : > { %v1865_v1 = vsel %vm1832_vm2, %v1793_v62, %v1849_v63 }
 0x2c5   : > { %v1880_v2 = vpack.c.bf16 %v1865_v1, %v1864_v0 }
 0x2c7   : > { %v1795_v4 = vpop.f32.mrf.mxu0  ;;  %1964 = vmatmul.bf16.vlgmr.msrb.gmra.mxu1 %v1880_v2 }
 0x2c8   : > { %v1796_v5 = vadd.f32 %v3687_v58, %v1795_v4 }
 0x2ca   : > { %v1850_v52 = vmul.f32 %v3690_v59, %v1796_v5  ;;  %vm1833_vm3 = vcmp.ge.f32.partialorder %v1796_v5, 0.0 }
 0x2cc   : > { %v1866_v10 = vsel %vm1833_vm3, %v1796_v5, %v1850_v52 }
 0x2cf   : > { %v1797_v6 = vpop.f32.mrf.mxu0 }
 0x2d0   : > { %v1798_v7 = vadd.f32 %v3687_v58, %v1797_v6 }
 0x2d2   : > { %v1851_v9 = vmul.f32 %v3690_v59, %v1798_v7  ;;  %vm1834_vm4 = vcmp.ge.f32.partialorder %v1798_v7, 0.0 }
 0x2d4   : > { %v1867_v11 = vsel %vm1834_vm4, %v1798_v7, %v1851_v9 }
 0x2d5   : > { %v1881_v12 = vpack.c.bf16 %v1867_v11, %v1866_v10 }
 0x2d7   : > { %v1800_v13 = vpop.f32.mrf.mxu0  ;;  %1969 = vmatmul.bf16.gmra.mxu1 %v1881_v12 }
 0x2d8   : > { %v1801_v14 = vadd.f32 %v3687_v58, %v1800_v13 }
 0x2da   : > { %v1852_v16 = vmul.f32 %v3690_v59, %v1801_v14  ;;  %vm1835_vm5 = vcmp.ge.f32.partialorder %v1801_v14, 0.0 }
 0x2dc   : > { %v1868_v18 = vsel %vm1835_vm5, %v1801_v14, %v1852_v16 }
 0x2df   : > { %v1802_v15 = vpop.f32.mrf.mxu0 }
 0x2e0   : > { %v1803_v17 = vadd.f32 %v3687_v58, %v1802_v15 }
 0x2e2   : > { %v1853_v56 = vmul.f32 %v3690_v59, %v1803_v17  ;;  %vm1836_vm6 = vcmp.ge.f32.partialorder %v1803_v17, 0.0 }
 0x2e4   : > { %v1869_v20 = vsel %vm1836_vm6, %v1803_v17, %v1853_v56 }
 0x2e5   : > { %v1882_v21 = vpack.c.bf16 %v1869_v20, %v1868_v18 }
 0x2e7   : > { %v1805_v22 = vpop.f32.mrf.mxu0  ;;  %1974 = vmatmul.bf16.gmra.mxu1 %v1882_v21 }
 0x2e8   : > { %v1806_v23 = vadd.f32 %v3687_v58, %v1805_v22 }
 0x2ea   : > { %v1854_v25 = vmul.f32 %v3690_v59, %v1806_v23  ;;  %vm1837_vm7 = vcmp.ge.f32.partialorder %v1806_v23, 0.0 }
 0x2ec   : > { %v1870_v28 = vsel %vm1837_vm7, %v1806_v23, %v1854_v25 }
 0x2ef   : > { %v1807_v3 = vpop.f32.mrf.mxu0 }
 0x2f0   : > { %v1808_v26 = vadd.f32 %v3687_v58, %v1807_v3 }
 0x2f2   : > { %v1855_v27 = vmul.f32 %v3690_v59, %v1808_v26  ;;  %vm1838_vm8 = vcmp.ge.f32.partialorder %v1808_v26, 0.0 }
 0x2f4   : > { %v1871_v29 = vsel %vm1838_vm8, %v1808_v26, %v1855_v27 }
 0x2f5   : > { %v1883_v30 = vpack.c.bf16 %v1871_v29, %v1870_v28 }
 0x2f7   : > { %v1810_v8 = vpop.f32.mrf.mxu0  ;;  %1979 = vmatmul.bf16.gmra.mxu1 %v1883_v30 }
 0x2f8   : > { %v1811_v31 = vadd.f32 %v3687_v58, %v1810_v8 }
 0x2fa   : > { %v1856_v33 = vmul.f32 %v3690_v59, %v1811_v31  ;;  %vm1839_vm9 = vcmp.ge.f32.partialorder %v1811_v31, 0.0 }
 0x2fc   : > { %v1872_v35 = vsel %vm1839_vm9, %v1811_v31, %v1856_v33 }
 0x2ff   : > { %v1812_v32 = vpop.f32.mrf.mxu0 }
 0x300   : > { %v1813_v19 = vadd.f32 %v3687_v58, %v1812_v32 }
 0x302   : > { %v1857_v34 = vmul.f32 %v3690_v59, %v1813_v19  ;;  %vm1840_vm10 = vcmp.ge.f32.partialorder %v1813_v19, 0.0 }
 0x304   : > { %v1873_v37 = vsel %vm1840_vm10, %v1813_v19, %v1857_v34 }
 0x305   : > { %v1884_v38 = vpack.c.bf16 %v1873_v37, %v1872_v35 }
 0x307   : > { %v1815_v39 = vpop.f32.mrf.mxu0  ;;  %1984 = vmatmul.bf16.gmra.mxu1 %v1884_v38 }
 0x308   : > { %v1816_v40 = vadd.f32 %v3687_v58, %v1815_v39 }
 0x30a   : > { %v1858_v43 = vmul.f32 %v3690_v59, %v1816_v40  ;;  %vm1841_vm11 = vcmp.ge.f32.partialorder %v1816_v40, 0.0 }
 0x30c   : > { %v1874_v45 = vsel %vm1841_vm11, %v1816_v40, %v1858_v43 }
 0x30f   : > { %v1817_v41 = vpop.f32.mrf.mxu0 }
 0x310   : > { %v1818_v24 = vadd.f32 %v3687_v58, %v1817_v41 }
 0x312   : > { %v1859_v44 = vmul.f32 %v3690_v59, %v1818_v24  ;;  %vm1842_vm12 = vcmp.ge.f32.partialorder %v1818_v24, 0.0 }
 0x314   : > { %v1875_v46 = vsel %vm1842_vm12, %v1818_v24, %v1859_v44 }
 0x315   : > { %v1885_v47 = vpack.c.bf16 %v1875_v46, %v1874_v45 }
 0x317   : > { %v1820_v48 = vpop.f32.mrf.mxu0  ;;  %1989 = vmatmul.bf16.gmra.mxu1 %v1885_v47 }
 0x318   : > { %v1821_v50 = vadd.f32 %v3687_v58, %v1820_v48 }
 0x31a   : > { %v1860_v51 = vmul.f32 %v3690_v59, %v1821_v50  ;;  %vm1843_vm13 = vcmp.ge.f32.partialorder %v1821_v50, 0.0 }
 0x31c   : > { %v1876_v42 = vsel %vm1843_vm13, %v1821_v50, %v1860_v51 }
 0x31f   : > { %v1822_v36 = vpop.f32.mrf.mxu0 }
 0x320   : > { %v1823_v53 = vadd.f32 %v3687_v58, %v1822_v36 }
 0x322   : > { %v1861_v54 = vmul.f32 %v3690_v59, %v1823_v53  ;;  %vm1844_vm14 = vcmp.ge.f32.partialorder %v1823_v53, 0.0 }
 0x324   : > { %v1877_v55 = vsel %vm1844_vm14, %v1823_v53, %v1861_v54 }
 0x325   : > { %v1886_v57 = vpack.c.bf16 %v1877_v55, %v1876_v42 }
 0x327   : > { %v1825_v49 = vpop.f32.mrf.mxu0  ;;  %1994 = vmatmul.bf16.gmra.mxu1 %v1886_v57 }
 0x328   : > { %v1826_v60 = vadd.f32 %v3687_v58, %v1825_v49 }
 0x32a   : > { %v1862_v62 = vmul.f32 %v3690_v59, %v1826_v60  ;;  %vm1845_vm15 = vcmp.ge.f32.partialorder %v1826_v60, 0.0 }
 0x32c   : > { %v1878_v1 = vsel %vm1845_vm15, %v1826_v60, %v1862_v62 }
 0x32f   : > { %v1827_v61 = vpop.f32.mrf.mxu0 }
 0x330   : > { %v1828_v63 = vadd.f32 %v3687_v58, %v1827_v61  ;;  %v3733_v58 = vld [vmem:[%s3826_s8] ss:$0 sm:$0xff] }
 0x332   : > { %v1863_v0 = vmul.f32 %v3690_v59, %v1828_v63  ;;  %vm1846_vm0 = vcmp.ge.f32.partialorder %v1828_v63, 0.0 }
 0x334   : > { %v1879_v2 = vsel %vm1846_vm0, %v1828_v63, %v1863_v0 }
 0x335   : > { %v1887_v4 = vpack.c.bf16 %v1879_v2, %v1878_v1 }
 0x337   : > { %1999 = vmatmul.bf16.gmra.mxu1 %v1887_v4 }
 0x338   : > { %3135 = shalt.err (!%p3132_p5)
}
 0x339   : > { %s3210_s24 = smov 128   ;;  %s3211_s11 = smov 8  }
 0x33a   : > { %3022 = dma.vmem_to_hbm [thread:$0]  (%p3319_p10), %s2040_s30, 2048, %s2042_s29, %s2022_s25, %s3210_s24, %s3210_s24, %s3211_s11  }
 0x33b   : > { %s2055_s25 = scalar_lea.hbm %s3828_s10, %s2799_s17  ;;  %s2056_s12 = sshll.u32 %s3368_s22, 4  ;;  %s2057_s12 = int_to_ptr.vmem [resolvable:$true] %s2056_s12 }
 0x33c   : > { %s2058_s28 = sshll.u32 %s2055_s25, 4  ;;  %s2027_s13 = scalar_lea.sflag [#allocation10], %s3355_s21  ;;  %s2059_s28 = int_to_ptr.hbm [resolvable:$true] %s2058_s28 }
 0x33d   : > { %s3150_s20 = sshra.s32 %s2059_s28, 4  ;;  %s3156_s17 = scalar_lea.hbm %s3828_s10, 512  ;;  %s3151_s20 = int_to_ptr.hbm [resolvable:$true] %s3150_s20 }
 0x33e   : > { %s3152_s14 = scalar_lea.hbm %s3151_s20, 128  ;;  %p3157_p1 = scmp.lt.s32.totalorder %s3151_s20, %s3828_s10 }
 0x33f   : > { %p3153_p7 = scmp.ne.s32.totalorder %s3151_s20, %s3152_s14  ;;  %p3158_p12 = scmp.lt.s32.totalorder %s3156_s17, %s3152_s14 }
 0x341   : > { %p3154_p8 = pnand %p3153_p7, %p3319_p10  ;;  %p3159_p6 = por %p3158_p12, %p3157_p1 }
 0x343   : > { %p3155_p9 = pneg %p3154_p8 }
 0x344   : > { %v1965_v59 = vpop.f32.mrf.mxu1 }
 0x345   : > { %v1966_v5 = vadd.f32 %v3733_v58, %v1965_v59  ;;  %p3160_p13 = pnand %p3159_p6, %p3155_p9 }
 0x347   : > { %2005 = vst [vmem:[%s3368_s22] sm:$0xff] %v1966_v5 }
 0x34c   : > { %v1967_v6 = vpop.f32.mrf.mxu1 }
 0x34d   : > { %v1968_v52 = vadd.f32 %v3733_v58, %v1967_v6 }
 0x34f   : > { %2006 = vst [vmem:[%s3368_s22 + $0x8] sm:$0xff] %v1968_v52 }
 0x354   : > { %v1970_v7 = vpop.f32.mrf.mxu1 }
 0x355   : > { %v1971_v9 = vadd.f32 %v3733_v58, %v1970_v7 }
 0x357   : > { %2007 = vst [vmem:[%s3368_s22 + $0x10] sm:$0xff] %v1971_v9 }
 0x35c   : > { %v1972_v10 = vpop.f32.mrf.mxu1 }
 0x35d   : > { %v1973_v11 = vadd.f32 %v3733_v58, %v1972_v10 }
 0x35f   : > { %2008 = vst [vmem:[%s3368_s22 + $0x18] sm:$0xff] %v1973_v11 }
 0x364   : > { %v1975_v12 = vpop.f32.mrf.mxu1 }
 0x365   : > { %v1976_v13 = vadd.f32 %v3733_v58, %v1975_v12 }
 0x367   : > { %2009 = vst [vmem:[%s3368_s22 + $0x20] sm:$0xff] %v1976_v13 }
 0x36c   : > { %v1977_v14 = vpop.f32.mrf.mxu1 }
 0x36d   : > { %v1978_v15 = vadd.f32 %v3733_v58, %v1977_v14 }
 0x36f   : > { %2010 = vst [vmem:[%s3368_s22 + $0x28] sm:$0xff] %v1978_v15 }
 0x374   : > { %v1980_v16 = vpop.f32.mrf.mxu1 }
 0x375   : > { %v1981_v17 = vadd.f32 %v3733_v58, %v1980_v16 }
 0x377   : > { %2011 = vst [vmem:[%s3368_s22 + $0x30] sm:$0xff] %v1981_v17 }
 0x37c   : > { %v1982_v56 = vpop.f32.mrf.mxu1 }
 0x37d   : > { %v1983_v18 = vadd.f32 %v3733_v58, %v1982_v56 }
 0x37f   : > { %2012 = vst [vmem:[%s3368_s22 + $0x38] sm:$0xff] %v1983_v18 }
 0x384   : > { %v1985_v20 = vpop.f32.mrf.mxu1 }
 0x385   : > { %v1986_v21 = vadd.f32 %v3733_v58, %v1985_v20 }
 0x387   : > { %2013 = vst [vmem:[%s3368_s22 + $0x40] sm:$0xff] %v1986_v21 }
 0x38c   : > { %v1987_v22 = vpop.f32.mrf.mxu1 }
 0x38d   : > { %v1988_v23 = vadd.f32 %v3733_v58, %v1987_v22 }
 0x38f   : > { %2014 = vst [vmem:[%s3368_s22 + $0x48] sm:$0xff] %v1988_v23 }
 0x394   : > { %v1990_v3 = vpop.f32.mrf.mxu1 }
 0x395   : > { %v1991_v25 = vadd.f32 %v3733_v58, %v1990_v3 }
 0x397   : > { %2015 = vst [vmem:[%s3368_s22 + $0x50] sm:$0xff] %v1991_v25 }
 0x39c   : > { %v1992_v26 = vpop.f32.mrf.mxu1 }
 0x39d   : > { %v1993_v27 = vadd.f32 %v3733_v58, %v1992_v26 }
 0x39f   : > { %2016 = vst [vmem:[%s3368_s22 + $0x58] sm:$0xff] %v1993_v27 }
 0x3a4   : > { %v1995_v28 = vpop.f32.mrf.mxu1 }
 0x3a5   : > { %v1996_v29 = vadd.f32 %v3733_v58, %v1995_v28 }
 0x3a7   : > { %2017 = vst [vmem:[%s3368_s22 + $0x60] sm:$0xff] %v1996_v29 }
 0x3ac   : > { %v1997_v30 = vpop.f32.mrf.mxu1 }
 0x3ad   : > { %v1998_v8 = vadd.f32 %v3733_v58, %v1997_v30 }
 0x3af   : > { %2018 = vst [vmem:[%s3368_s22 + $0x68] sm:$0xff] %v1998_v8 }
 0x3b4   : > { %v2000_v31 = vpop.f32.mrf.mxu1 }
 0x3b5   : > { %v2001_v32 = vadd.f32 %v3733_v58, %v2000_v31 }
 0x3b7   : > { %2019 = vst [vmem:[%s3368_s22 + $0x70] sm:$0xff] %v2001_v32 }
 0x3bc   : > { %v2002_v33 = vpop.f32.mrf.mxu1 }
 0x3bd   : > { %v2003_v19 = vadd.f32 %v3733_v58, %v2002_v33 }
 0x3bf   : > { %2020 = vst [vmem:[%s3368_s22 + $0x78] sm:$0xff] %v2003_v19 }
 0x3c0   : > { %3163 = shalt.err (!%p3160_p13)
}
 0x3c1   : > { %3023 = dma.vmem_to_hbm [thread:$0]  (%p3319_p10), %s2057_s12, 2048, %s2059_s28, %s2027_s13, %s3210_s24, %s3210_s24, %s3211_s11  }
 0x3c2 PF: > { %p3038_p0 = scmp.ge.s32.totalorder %s3206_s18, 2  ;;  %s2073_s21 = sand.u32 1, %s3194_s15  }
 0x3c3   : > { %s2074_s22 = scalar_lea.sflag [#allocation7], %s2073_s21 }
 0x3c4   : > { %p3031_p2 = pnand %p3038_p0, %p3323_p11 }
 0x3c6   : > { %p3032_p3 = pneg %p3031_p2 }
 0x3c8   : > { %3185 = dma.done.wait (%p3032_p3), %s2074_s22, 2048  }
 0x3c9   : > { %3187 = vsyncadd (%p3032_p3), %s2074_s22, 4294965248  ;;  %s2084_s29 = scalar_lea.sflag [#allocation10], %s2073_s21 }
 0x3ca   : > { %3189 = dma.done.wait (%p3032_p3), %s2084_s29, 2048  }
 0x3cb   : > { %3191 = vsyncadd (%p3032_p3), %s2084_s29, 4294965248  ;;  %s3840_s18 = sld [smem:[#allocation15_spill]]  ;;  %s3843_s15 = smov %s3198_s16 }
 0x3cc   : > { %s3841_s26 = sld [smem:[#allocation14_spill]] }
 0x3cd   : > { %s3842_s17 = sld [smem:[#allocation16_spill]] }
 0x3d1   : > { %p28_p10 = scmp.ge.s32.totalorder %s3840_s18, 6  }
 0x3d2   : > { %s3844_s16 = smov %s3841_s26 }
 0x3d3   :  { %30 = sbr.rel (!%p28_p10) target bundleno = 9 (0x9), region = 118 }
 0x3d8   :  { %2090 = vsyncpa [#allocation6], 1 }
 0x3d9   :  { %2092 = vsyncpa [#allocation6 + $0x1], 1 }
 0x3da   :  { %2093 = vsyncpa [#allocation7], 1 }
 0x3db   :  { %2095 = vsyncpa [#allocation7 + $0x1], 1 }
 0x3dc   :  { %2096 = vsyncpa [#allocation10], 1 }
 0x3dd   :  { %2098 = vsyncpa [#allocation10 + $0x1], 1 }

</bundles_post_ra>
